<compile_context>
chip_gen: v5e
topology: v5e:2x2
jax: 0.10.0
libtpu: 0.0.40
codegen_flags: <defaults>
</compile_context>

<pallas_src>
import functools

import jax
import jax.numpy as jnp
from jax import lax
from jax.experimental import pallas as pl
from jax.experimental.pallas import tpu as pltpu


# ----------------------------------------------------------------------------
# Kernel: one grid step == one batch element.  The whole block (norm1 -> MHSA
# -> residual -> norm2 -> MLP -> residual) runs inside the kernel.
# ----------------------------------------------------------------------------
def transformer_block_kernel(x_ref, wqkv_ref, wo_ref, bo_ref,
                             w1_ref, b1_ref, w2_ref, b2_ref,
                             o_ref, ctx_ref, *, num_heads, head_dim):
    eps = jnp.float32(1e-5)
    x = x_ref[...].astype(jnp.float32)                       # (L, D)
    D = num_heads * head_dim

    # ---- InstanceNorm #1: normalize over all (L, D) of this batch element.
    #      Two-pass variance (subtract mean first) for numerical stability.
    m1 = jnp.mean(x)
    xc = x - m1
    v1 = jnp.mean(xc * xc)
    h_bf = (xc * lax.rsqrt(v1 + eps)).astype(jnp.bfloat16)

    # ---- Fused QKV projection: one lane-dense matmul, f32 accumulation.
    #      Column order is (qkv, head, head_dim) to match
    #      Rearrange('b h (qkv l d) -> qkv b l h d').  The 1/sqrt(hd) scale is
    #      already folded into the q columns (done in the wrapper).
    qkv = jnp.dot(h_bf, wqkv_ref[...],
                  preferred_element_type=jnp.float32).astype(jnp.bfloat16)

    # ---- Per-head attention.  Static loop (static lane slices lower reliably;
    #      a fori_loop would need dynamic lane offsets that are not 128-aligned
    #      when hd < 128).  Each head's context is stored into its lane stripe
    #      of the (L, D) VMEM scratch, killing the head's temporaries.
    for hi in range(num_heads):
        qo = hi * head_dim
        ko = D + qo
        vo = 2 * D + qo
        q = qkv[:, qo:qo + head_dim]                          # (L, hd) bf16
        k = qkv[:, ko:ko + head_dim]                          # (L, hd) bf16
        v = qkv[:, vo:vo + head_dim]                          # (L, hd) bf16

        # scores: contract last dims directly (no explicit k.T materialization)
        s = lax.dot_general(q, k, (((1,), (1,)), ((), ())),
                            preferred_element_type=jnp.float32)       # (L, L)
        s = s - jnp.max(s, axis=-1, keepdims=True)
        p = jnp.exp(s)
        p = p * pl.reciprocal(jnp.sum(p, axis=-1, keepdims=True), approx=True)

        ctx = jnp.dot(p.astype(jnp.bfloat16), v,
                      preferred_element_type=jnp.float32)              # (L, hd)
        ctx_ref[:, qo:qo + head_dim] = ctx        # head stripe of (L, D) scratch

    # ---- Single full-K output projection (K = D), bias, residual 1.
    attn = jnp.dot(ctx_ref[...].astype(jnp.bfloat16), wo_ref[...],
                   preferred_element_type=jnp.float32) + bo_ref[...]
    x1 = x + attn

    # ---- InstanceNorm #2 (same two-pass form)
    m2 = jnp.mean(x1)
    x1c = x1 - m2
    v2 = jnp.mean(x1c * x1c)
    h2_bf = (x1c * lax.rsqrt(v2 + eps)).astype(jnp.bfloat16)

    # ---- MLP: linear1 -> exact GELU (erf) -> linear2
    z = jnp.dot(h2_bf, w1_ref[...],
                preferred_element_type=jnp.float32) + b1_ref[...]
    z = 0.5 * z * (1.0 + lax.erf(z * jnp.float32(0.7071067811865476)))
    z = jnp.dot(z.astype(jnp.bfloat16), w2_ref[...],
                preferred_element_type=jnp.float32) + b2_ref[...]

    o_ref[...] = (x1 + z).astype(o_ref.dtype)                 # residual 2


# ----------------------------------------------------------------------------
# Wrapper
# ----------------------------------------------------------------------------
@functools.lru_cache(maxsize=None)
def _vmem_limit_bytes():
    """Generation-aware VMEM budget: ~3/4 of physical VMEM, capped at 112 MiB.

    -> ~48 MiB on v7x (64 MiB physical), ~96 MiB on v5e/v6e (128 MiB physical).
    """
    cap = 128 * 1024 * 1024
    try:
        cap = int(pltpu.get_tpu_info().vmem_capacity_bytes)
    except Exception:
        pass
    return min((cap * 3) // 4, 112 * 1024 * 1024)


@functools.partial(jax.jit, static_argnames=("num_heads", "vmem_limit", "fast"))
def _transformer_block_impl(x, wqkv_t, wo_t, bo, w1_t, b1, w2_t, b2, *,
                            num_heads, vmem_limit, fast):
    B, L, D = x.shape
    head_dim = D // num_heads
    mlp_dim = w1_t.shape[1]
    kernel = functools.partial(transformer_block_kernel,
                               num_heads=num_heads, head_dim=head_dim)

    def weight_spec(shape):
        ndim = len(shape)
        index_map = lambda b: (0,) * ndim
        if fast:
            # Grid-invariant block: single-buffer it (never re-fetched), which
            # halves its VMEM footprint vs the default double buffering.
            return pl.BlockSpec(shape, index_map, pipeline_mode=pl.Buffered(1))
        return pl.BlockSpec(shape, index_map)

    cost = None
    if fast:
        flops = 2 * B * L * (D * 3 * D                       # qkv projection
                             + 2 * num_heads * L * head_dim  # scores + context
                             + D * D                         # out projection
                             + 2 * D * mlp_dim)              # mlp
        transcendentals = B * (num_heads * L * L + L * mlp_dim)
        weight_bytes = sum(int(a.size) * a.dtype.itemsize
                           for a in (wqkv_t, wo_t, bo, w1_t, b1, w2_t, b2))
        bytes_accessed = weight_bytes + 2 * B * L * D * x.dtype.itemsize
        cost = pl.CostEstimate(flops=int(flops),
                               transcendentals=int(transcendentals),
                               bytes_accessed=int(bytes_accessed))

    return pl.pallas_call(
        kernel,
        out_shape=jax.ShapeDtypeStruct((B, L, D), x.dtype),
        grid_spec=pltpu.PrefetchScalarGridSpec(
            num_scalar_prefetch=0,
            grid=(B,),
            in_specs=[
                pl.BlockSpec((None, L, D), lambda b: (b, 0, 0)),  # x (squeeze B)
                weight_spec(wqkv_t.shape),   # (D, 3D)   bf16 (q cols pre-scaled)
                weight_spec(wo_t.shape),     # (D, D)    bf16
                weight_spec(bo.shape),       # (1, D)    f32
                weight_spec(w1_t.shape),     # (D, mlp)  bf16
                weight_spec(b1.shape),       # (1, mlp)  f32
                weight_spec(w2_t.shape),     # (mlp, D)  bf16
                weight_spec(b2.shape),       # (1, D)    f32
            ],
            out_specs=pl.BlockSpec((None, L, D), lambda b: (b, 0, 0)),
            scratch_shapes=[pltpu.VMEM((L, D), jnp.float32)],    # ctx stripes
        ),
        compiler_params=pltpu.CompilerParams(
            dimension_semantics=("parallel",),
            vmem_limit_bytes=vmem_limit),
        cost_estimate=cost,
    )(x, wqkv_t, wo_t, bo, w1_t, b1, w2_t, b2)


def transformer_block(x, wqkv_t, wo_t, bo, w1_t, b1, w2_t, b2, *, num_heads):
    vmem_limit = _vmem_limit_bytes()
    args = (x, wqkv_t, wo_t, bo, w1_t, b1, w2_t, b2)
    try:
        return _transformer_block_impl(*args, num_heads=num_heads,
                                       vmem_limit=vmem_limit, fast=True)
    except Exception:
        # Fallback for JAX versions lacking pl.Buffered / pl.CostEstimate.
        return _transformer_block_impl(*args, num_heads=num_heads,
                                       vmem_limit=vmem_limit, fast=False)


# ----------------------------------------------------------------------------
# Pure-JAX f32 reference (mirrors the PyTorch forward exactly)
# ----------------------------------------------------------------------------
def reference(x, Wqkv, Wo, bo, W1, b1, W2, b2, num_heads):
    B, L, D = x.shape
    hd = D // num_heads

    def inorm(t):  # InstanceNorm2d on 3D input == normalize over (L, D) per b
        m = jnp.mean(t, axis=(1, 2), keepdims=True)
        v = jnp.mean((t - m) ** 2, axis=(1, 2), keepdims=True)
        return (t - m) / jnp.sqrt(v + 1e-5)

    h = inorm(x)
    qkv = h @ Wqkv.T                                            # (B, L, 3D)
    qkv = qkv.reshape(B, L, 3, num_heads, hd).transpose(2, 0, 3, 1, 4)
    q, k, v = qkv[0], qkv[1], qkv[2]                            # (B, nh, L, hd)
    att = jax.nn.softmax(
        jnp.einsum('bhxd,bhyd->bhxy', q, k) * (hd ** -0.5), axis=-1)
    o = jnp.einsum('bhxy,bhyd->bhxd', att, v)
    o = o.transpose(0, 2, 1, 3).reshape(B, L, D)
    o = o @ Wo.T + bo
    x1 = x + o
    h2 = inorm(x1)
    z = h2 @ W1.T + b1
    z = 0.5 * z * (1.0 + lax.erf(z / jnp.sqrt(2.0)))
    z = z @ W2.T + b2
    return x1 + z


if __name__ == "__main__":
    # Small, module-consistent shapes.
    B, L, D = 2, 8, 32
    num_heads = 4
    hd = D // num_heads
    mlp_dim = 64

    key = jax.random.PRNGKey(0)
    ks = jax.random.split(key, 8)

    x = jax.random.normal(ks[0], (B, L, D), dtype=jnp.float32)

    # Deterministic synthetic parameters (PyTorch Linear convention: W is (out, in)).
    Wqkv = 0.05 * jax.random.normal(ks[1], (3 * D, D), dtype=jnp.float32)  # qkv (no bias)
    Wo   = 0.05 * jax.random.normal(ks[2], (D, D), dtype=jnp.float32)
    bo   = 0.05 * jax.random.normal(ks[3], (D,), dtype=jnp.float32)
    W1   = 0.05 * jax.random.normal(ks[4], (mlp_dim, D), dtype=jnp.float32)
    b1   = 0.05 * jax.random.normal(ks[5], (mlp_dim,), dtype=jnp.float32)
    W2   = 0.05 * jax.random.normal(ks[6], (D, mlp_dim), dtype=jnp.float32)
    b2   = 0.05 * jax.random.normal(ks[7], (D,), dtype=jnp.float32)

    # Pack weights for the kernel (bf16 MXU operands, f32 biases):
    #  - fused QKV weight, transposed for right-multiplication: (D, 3D); its
    #    output-column order (qkv, head, hd) matches the PyTorch Rearrange, and
    #    the softmax scale 1/sqrt(hd) is folded into the q columns.
    #  - output projection as a single transposed (D, D) array (full-K matmul).
    wqkv_t = Wqkv.T
    wqkv_t = wqkv_t.at[:, :D].multiply(hd ** -0.5)
    wqkv_t = wqkv_t.astype(jnp.bfloat16)                        # (D, 3D)
    wo_t   = Wo.T.astype(jnp.bfloat16)                          # (D, D)
    w1_t   = W1.T.astype(jnp.bfloat16)                          # (D, mlp)
    w2_t   = W2.T.astype(jnp.bfloat16)                          # (mlp, D)

    out = transformer_block(
        x, wqkv_t, wo_t, bo.reshape(1, D),
        w1_t, b1.reshape(1, mlp_dim), w2_t, b2.reshape(1, D),
        num_heads=num_heads)
    out = jax.block_until_ready(out)

    ref = reference(x, Wqkv, Wo, bo, W1, b1, W2, b2, num_heads)
    assert out.shape == (B, L, D)
    # bf16 MXU operands with f32 accumulation -> slightly looser tolerance.
    assert jnp.allclose(out, ref, atol=2e-2, rtol=2e-2), \
        float(jnp.max(jnp.abs(out - ref)))

    print("KERNEL_OK")
</pallas_src>

<mosaic_0001>
module attributes {stable_mosaic.version = 11 : i64} {
  func.func @transformer_block_kernel(%arg0: i32, %arg1: memref<1x8x32xf32, #tpu.memory_space<vmem>>, %arg2: memref<32x96xbf16, #tpu.memory_space<vmem>>, %arg3: memref<32x32xbf16, #tpu.memory_space<vmem>>, %arg4: memref<1x32xf32, #tpu.memory_space<vmem>>, %arg5: memref<32x64xbf16, #tpu.memory_space<vmem>>, %arg6: memref<1x64xf32, #tpu.memory_space<vmem>>, %arg7: memref<64x32xbf16, #tpu.memory_space<vmem>>, %arg8: memref<1x32xf32, #tpu.memory_space<vmem>>, %arg9: memref<1x8x32xf32, #tpu.memory_space<vmem>>, %arg10: memref<8x32xf32, #tpu.memory_space<vmem>>) attributes {dimension_semantics = [#tpu.dimension_semantics<parallel>], iteration_bounds = array<i64: 2>, scalar_prefetch = 0 : i64, scratch_operands = 1 : i64, tpu.core_type = #tpu.core_type<tc>, window_params = [{transform_indices = @transform_0, window_bounds = array<i64: 1, 8, 32>}, {pipeline_mode = #tpu.pipeline_mode<synchronous>, transform_indices = @transform_1, window_bounds = array<i64: 32, 96>}, {pipeline_mode = #tpu.pipeline_mode<synchronous>, transform_indices = @transform_2, window_bounds = array<i64: 32, 32>}, {pipeline_mode = #tpu.pipeline_mode<synchronous>, transform_indices = @transform_3, window_bounds = array<i64: 1, 32>}, {pipeline_mode = #tpu.pipeline_mode<synchronous>, transform_indices = @transform_4, window_bounds = array<i64: 32, 64>}, {pipeline_mode = #tpu.pipeline_mode<synchronous>, transform_indices = @transform_5, window_bounds = array<i64: 1, 64>}, {pipeline_mode = #tpu.pipeline_mode<synchronous>, transform_indices = @transform_6, window_bounds = array<i64: 64, 32>}, {pipeline_mode = #tpu.pipeline_mode<synchronous>, transform_indices = @transform_7, window_bounds = array<i64: 1, 32>}, {transform_indices = @transform_8, window_bounds = array<i64: 1, 8, 32>}]} {
    %c0 = arith.constant 0 : index
    %c0_0 = arith.constant 0 : index
    %c0_1 = arith.constant 0 : index
    %0 = vector.load %arg1[%c0, %c0_0, %c0_1] : memref<1x8x32xf32, #tpu.memory_space<vmem>>, vector<1x8x32xf32>
    %1 = vector.shape_cast %0 : vector<1x8x32xf32> to vector<8x32xf32>
    %2 = vector.shape_cast %1 : vector<8x32xf32> to vector<1x8x32xf32>
    %cst = arith.constant dense<0.000000e+00> : vector<1xf32>
    %3 = vector.multi_reduction <add>, %2, %cst [1, 2] : vector<1x8x32xf32> to vector<1xf32>
    %4 = vector.shape_cast %3 : vector<1xf32> to vector<1x1x1xf32>
    %5 = vector.extract %4[0, 0, 0] : f32 from vector<1x1x1xf32>
    %cst_2 = arith.constant 2.560000e+02 : f32
    %6 = arith.divf %5, %cst_2 : f32
    %7 = vector.broadcast %6 : f32 to vector<8x32xf32>
    %8 = arith.subf %1, %7 : vector<8x32xf32>
    %9 = arith.mulf %8, %8 : vector<8x32xf32>
    %10 = vector.shape_cast %9 : vector<8x32xf32> to vector<1x8x32xf32>
    %cst_3 = arith.constant dense<0.000000e+00> : vector<1xf32>
    %11 = vector.multi_reduction <add>, %10, %cst_3 [1, 2] : vector<1x8x32xf32> to vector<1xf32>
    %12 = vector.shape_cast %11 : vector<1xf32> to vector<1x1x1xf32>
    %13 = vector.extract %12[0, 0, 0] : f32 from vector<1x1x1xf32>
    %cst_4 = arith.constant 2.560000e+02 : f32
    %14 = arith.divf %13, %cst_4 : f32
    %cst_5 = arith.constant 9.99999974E-6 : f32
    %15 = arith.addf %14, %cst_5 : f32
    %16 = math.rsqrt %15 : f32
    %17 = vector.broadcast %16 : f32 to vector<8x32xf32>
    %18 = arith.mulf %8, %17 : vector<8x32xf32>
    %19 = arith.truncf %18 : vector<8x32xf32> to vector<8x32xbf16>
    %c0_6 = arith.constant 0 : index
    %c0_7 = arith.constant 0 : index
    %20 = vector.load %arg2[%c0_6, %c0_7] : memref<32x96xbf16, #tpu.memory_space<vmem>>, vector<32x96xbf16>
    %cst_8 = arith.constant dense<0.000000e+00> : vector<8x96xf32>
    %21 = tpu.matmul %19, %20, %cst_8 {dimension_numbers = #tpu.dot_dimension_numbers<[1], [0], [0], [1], [0, 0, 1, 1], [], []>} : vector<8x32xbf16>, vector<32x96xbf16>, vector<8x96xf32> -> vector<8x96xf32>
    %22 = arith.truncf %21 : vector<8x96xf32> to vector<8x96xbf16>
    %23 = vector.extract_strided_slice %22 {offsets = [0, 0], sizes = [8, 8], strides = [1, 1]} : vector<8x96xbf16> to vector<8x8xbf16>
    %24 = vector.extract_strided_slice %22 {offsets = [0, 32], sizes = [8, 8], strides = [1, 1]} : vector<8x96xbf16> to vector<8x8xbf16>
    %25 = vector.extract_strided_slice %22 {offsets = [0, 64], sizes = [8, 8], strides = [1, 1]} : vector<8x96xbf16> to vector<8x8xbf16>
    %cst_9 = arith.constant dense<0.000000e+00> : vector<8x8xf32>
    %26 = tpu.matmul %23, %24, %cst_9 {dimension_numbers = #tpu.dot_dimension_numbers<[1], [1], [0], [0], [0, 0, 1, 0], [], []>} : vector<8x8xbf16>, vector<8x8xbf16>, vector<8x8xf32> -> vector<8x8xf32>
    %cst_10 = arith.constant dense<0xFF800000> : vector<8xf32>
    %27 = vector.multi_reduction <maximumf>, %26, %cst_10 [1] : vector<8x8xf32> to vector<8xf32>
    %28 = vector.shape_cast %27 : vector<8xf32> to vector<8x1xf32>
    %29 = vector.broadcast %28 : vector<8x1xf32> to vector<8x8xf32>
    %30 = arith.subf %26, %29 : vector<8x8xf32>
    %31 = math.exp %30 : vector<8x8xf32>
    %cst_11 = arith.constant dense<0.000000e+00> : vector<8xf32>
    %32 = vector.multi_reduction <add>, %31, %cst_11 [1] : vector<8x8xf32> to vector<8xf32>
    %33 = vector.shape_cast %32 : vector<8xf32> to vector<8x1xf32>
    %34 = tpu.reciprocal %33 {approx = true} : vector<8x1xf32> -> vector<8x1xf32>
    %35 = vector.broadcast %34 : vector<8x1xf32> to vector<8x8xf32>
    %36 = arith.mulf %31, %35 : vector<8x8xf32>
    %37 = arith.truncf %36 : vector<8x8xf32> to vector<8x8xbf16>
    %cst_12 = arith.constant dense<0.000000e+00> : vector<8x8xf32>
    %38 = tpu.matmul %37, %25, %cst_12 {dimension_numbers = #tpu.dot_dimension_numbers<[1], [0], [0], [1], [0, 0, 1, 1], [], []>} : vector<8x8xbf16>, vector<8x8xbf16>, vector<8x8xf32> -> vector<8x8xf32>
    %c0_13 = arith.constant 0 : index
    %c0_14 = arith.constant 0 : index
    %39 = vector.load %arg10[%c0_13, %c0_14] : memref<8x32xf32, #tpu.memory_space<vmem>>, vector<8x8xf32>
    tpu.vector_store %arg10[%c0_13, %c0_14], %38 {strides = array<i32>} : memref<8x32xf32, #tpu.memory_space<vmem>>, vector<8x8xf32>,
    %40 = vector.extract_strided_slice %22 {offsets = [0, 8], sizes = [8, 8], strides = [1, 1]} : vector<8x96xbf16> to vector<8x8xbf16>
    %41 = vector.extract_strided_slice %22 {offsets = [0, 40], sizes = [8, 8], strides = [1, 1]} : vector<8x96xbf16> to vector<8x8xbf16>
    %42 = vector.extract_strided_slice %22 {offsets = [0, 72], sizes = [8, 8], strides = [1, 1]} : vector<8x96xbf16> to vector<8x8xbf16>
    %cst_15 = arith.constant dense<0.000000e+00> : vector<8x8xf32>
    %43 = tpu.matmul %40, %41, %cst_15 {dimension_numbers = #tpu.dot_dimension_numbers<[1], [1], [0], [0], [0, 0, 1, 0], [], []>} : vector<8x8xbf16>, vector<8x8xbf16>, vector<8x8xf32> -> vector<8x8xf32>
    %cst_16 = arith.constant dense<0xFF800000> : vector<8xf32>
    %44 = vector.multi_reduction <maximumf>, %43, %cst_16 [1] : vector<8x8xf32> to vector<8xf32>
    %45 = vector.shape_cast %44 : vector<8xf32> to vector<8x1xf32>
    %46 = vector.broadcast %45 : vector<8x1xf32> to vector<8x8xf32>
    %47 = arith.subf %43, %46 : vector<8x8xf32>
    %48 = math.exp %47 : vector<8x8xf32>
    %cst_17 = arith.constant dense<0.000000e+00> : vector<8xf32>
    %49 = vector.multi_reduction <add>, %48, %cst_17 [1] : vector<8x8xf32> to vector<8xf32>
    %50 = vector.shape_cast %49 : vector<8xf32> to vector<8x1xf32>
    %51 = tpu.reciprocal %50 {approx = true} : vector<8x1xf32> -> vector<8x1xf32>
    %52 = vector.broadcast %51 : vector<8x1xf32> to vector<8x8xf32>
    %53 = arith.mulf %48, %52 : vector<8x8xf32>
    %54 = arith.truncf %53 : vector<8x8xf32> to vector<8x8xbf16>
    %cst_18 = arith.constant dense<0.000000e+00> : vector<8x8xf32>
    %55 = tpu.matmul %54, %42, %cst_18 {dimension_numbers = #tpu.dot_dimension_numbers<[1], [0], [0], [1], [0, 0, 1, 1], [], []>} : vector<8x8xbf16>, vector<8x8xbf16>, vector<8x8xf32> -> vector<8x8xf32>
    %c0_19 = arith.constant 0 : index
    %c8 = arith.constant 8 : index
    %56 = vector.load %arg10[%c0_19, %c8] : memref<8x32xf32, #tpu.memory_space<vmem>>, vector<8x8xf32>
    tpu.vector_store %arg10[%c0_19, %c8], %55 {strides = array<i32>} : memref<8x32xf32, #tpu.memory_space<vmem>>, vector<8x8xf32>,
    %57 = vector.extract_strided_slice %22 {offsets = [0, 16], sizes = [8, 8], strides = [1, 1]} : vector<8x96xbf16> to vector<8x8xbf16>
    %58 = vector.extract_strided_slice %22 {offsets = [0, 48], sizes = [8, 8], strides = [1, 1]} : vector<8x96xbf16> to vector<8x8xbf16>
    %59 = vector.extract_strided_slice %22 {offsets = [0, 80], sizes = [8, 8], strides = [1, 1]} : vector<8x96xbf16> to vector<8x8xbf16>
    %cst_20 = arith.constant dense<0.000000e+00> : vector<8x8xf32>
    %60 = tpu.matmul %57, %58, %cst_20 {dimension_numbers = #tpu.dot_dimension_numbers<[1], [1], [0], [0], [0, 0, 1, 0], [], []>} : vector<8x8xbf16>, vector<8x8xbf16>, vector<8x8xf32> -> vector<8x8xf32>
    %cst_21 = arith.constant dense<0xFF800000> : vector<8xf32>
    %61 = vector.multi_reduction <maximumf>, %60, %cst_21 [1] : vector<8x8xf32> to vector<8xf32>
    %62 = vector.shape_cast %61 : vector<8xf32> to vector<8x1xf32>
    %63 = vector.broadcast %62 : vector<8x1xf32> to vector<8x8xf32>
    %64 = arith.subf %60, %63 : vector<8x8xf32>
    %65 = math.exp %64 : vector<8x8xf32>
    %cst_22 = arith.constant dense<0.000000e+00> : vector<8xf32>
    %66 = vector.multi_reduction <add>, %65, %cst_22 [1] : vector<8x8xf32> to vector<8xf32>
    %67 = vector.shape_cast %66 : vector<8xf32> to vector<8x1xf32>
    %68 = tpu.reciprocal %67 {approx = true} : vector<8x1xf32> -> vector<8x1xf32>
    %69 = vector.broadcast %68 : vector<8x1xf32> to vector<8x8xf32>
    %70 = arith.mulf %65, %69 : vector<8x8xf32>
    %71 = arith.truncf %70 : vector<8x8xf32> to vector<8x8xbf16>
    %cst_23 = arith.constant dense<0.000000e+00> : vector<8x8xf32>
    %72 = tpu.matmul %71, %59, %cst_23 {dimension_numbers = #tpu.dot_dimension_numbers<[1], [0], [0], [1], [0, 0, 1, 1], [], []>} : vector<8x8xbf16>, vector<8x8xbf16>, vector<8x8xf32> -> vector<8x8xf32>
    %c0_24 = arith.constant 0 : index
    %c16 = arith.constant 16 : index
    %73 = vector.load %arg10[%c0_24, %c16] : memref<8x32xf32, #tpu.memory_space<vmem>>, vector<8x8xf32>
    tpu.vector_store %arg10[%c0_24, %c16], %72 {strides = array<i32>} : memref<8x32xf32, #tpu.memory_space<vmem>>, vector<8x8xf32>,
    %74 = vector.extract_strided_slice %22 {offsets = [0, 24], sizes = [8, 8], strides = [1, 1]} : vector<8x96xbf16> to vector<8x8xbf16>
    %75 = vector.extract_strided_slice %22 {offsets = [0, 56], sizes = [8, 8], strides = [1, 1]} : vector<8x96xbf16> to vector<8x8xbf16>
    %76 = vector.extract_strided_slice %22 {offsets = [0, 88], sizes = [8, 8], strides = [1, 1]} : vector<8x96xbf16> to vector<8x8xbf16>
    %cst_25 = arith.constant dense<0.000000e+00> : vector<8x8xf32>
    %77 = tpu.matmul %74, %75, %cst_25 {dimension_numbers = #tpu.dot_dimension_numbers<[1], [1], [0], [0], [0, 0, 1, 0], [], []>} : vector<8x8xbf16>, vector<8x8xbf16>, vector<8x8xf32> -> vector<8x8xf32>
    %cst_26 = arith.constant dense<0xFF800000> : vector<8xf32>
    %78 = vector.multi_reduction <maximumf>, %77, %cst_26 [1] : vector<8x8xf32> to vector<8xf32>
    %79 = vector.shape_cast %78 : vector<8xf32> to vector<8x1xf32>
    %80 = vector.broadcast %79 : vector<8x1xf32> to vector<8x8xf32>
    %81 = arith.subf %77, %80 : vector<8x8xf32>
    %82 = math.exp %81 : vector<8x8xf32>
    %cst_27 = arith.constant dense<0.000000e+00> : vector<8xf32>
    %83 = vector.multi_reduction <add>, %82, %cst_27 [1] : vector<8x8xf32> to vector<8xf32>
    %84 = vector.shape_cast %83 : vector<8xf32> to vector<8x1xf32>
    %85 = tpu.reciprocal %84 {approx = true} : vector<8x1xf32> -> vector<8x1xf32>
    %86 = vector.broadcast %85 : vector<8x1xf32> to vector<8x8xf32>
    %87 = arith.mulf %82, %86 : vector<8x8xf32>
    %88 = arith.truncf %87 : vector<8x8xf32> to vector<8x8xbf16>
    %cst_28 = arith.constant dense<0.000000e+00> : vector<8x8xf32>
    %89 = tpu.matmul %88, %76, %cst_28 {dimension_numbers = #tpu.dot_dimension_numbers<[1], [0], [0], [1], [0, 0, 1, 1], [], []>} : vector<8x8xbf16>, vector<8x8xbf16>, vector<8x8xf32> -> vector<8x8xf32>
    %c0_29 = arith.constant 0 : index
    %c24 = arith.constant 24 : index
    %90 = vector.load %arg10[%c0_29, %c24] : memref<8x32xf32, #tpu.memory_space<vmem>>, vector<8x8xf32>
    tpu.vector_store %arg10[%c0_29, %c24], %89 {strides = array<i32>} : memref<8x32xf32, #tpu.memory_space<vmem>>, vector<8x8xf32>,
    %c0_30 = arith.constant 0 : index
    %c0_31 = arith.constant 0 : index
    %91 = vector.load %arg10[%c0_30, %c0_31] : memref<8x32xf32, #tpu.memory_space<vmem>>, vector<8x32xf32>
    %92 = arith.truncf %91 : vector<8x32xf32> to vector<8x32xbf16>
    %c0_32 = arith.constant 0 : index
    %c0_33 = arith.constant 0 : index
    %93 = vector.load %arg3[%c0_32, %c0_33] : memref<32x32xbf16, #tpu.memory_space<vmem>>, vector<32x32xbf16>
    %cst_34 = arith.constant dense<0.000000e+00> : vector<8x32xf32>
    %94 = tpu.matmul %92, %93, %cst_34 {dimension_numbers = #tpu.dot_dimension_numbers<[1], [0], [0], [1], [0, 0, 1, 1], [], []>} : vector<8x32xbf16>, vector<32x32xbf16>, vector<8x32xf32> -> vector<8x32xf32>
    %c0_35 = arith.constant 0 : index
    %c0_36 = arith.constant 0 : index
    %95 = vector.load %arg4[%c0_35, %c0_36] : memref<1x32xf32, #tpu.memory_space<vmem>>, vector<1x32xf32>
    %96 = vector.broadcast %95 : vector<1x32xf32> to vector<8x32xf32>
    %97 = arith.addf %94, %96 : vector<8x32xf32>
    %98 = arith.addf %1, %97 : vector<8x32xf32>
    %99 = vector.shape_cast %98 : vector<8x32xf32> to vector<1x8x32xf32>
    %cst_37 = arith.constant dense<0.000000e+00> : vector<1xf32>
    %100 = vector.multi_reduction <add>, %99, %cst_37 [1, 2] : vector<1x8x32xf32> to vector<1xf32>
    %101 = vector.shape_cast %100 : vector<1xf32> to vector<1x1x1xf32>
    %102 = vector.extract %101[0, 0, 0] : f32 from vector<1x1x1xf32>
    %cst_38 = arith.constant 2.560000e+02 : f32
    %103 = arith.divf %102, %cst_38 : f32
    %104 = vector.broadcast %103 : f32 to vector<8x32xf32>
    %105 = arith.subf %98, %104 : vector<8x32xf32>
    %106 = arith.mulf %105, %105 : vector<8x32xf32>
    %107 = vector.shape_cast %106 : vector<8x32xf32> to vector<1x8x32xf32>
    %cst_39 = arith.constant dense<0.000000e+00> : vector<1xf32>
    %108 = vector.multi_reduction <add>, %107, %cst_39 [1, 2] : vector<1x8x32xf32> to vector<1xf32>
    %109 = vector.shape_cast %108 : vector<1xf32> to vector<1x1x1xf32>
    %110 = vector.extract %109[0, 0, 0] : f32 from vector<1x1x1xf32>
    %cst_40 = arith.constant 2.560000e+02 : f32
    %111 = arith.divf %110, %cst_40 : f32
    %cst_41 = arith.constant 9.99999974E-6 : f32
    %112 = arith.addf %111, %cst_41 : f32
    %113 = math.rsqrt %112 : f32
    %114 = vector.broadcast %113 : f32 to vector<8x32xf32>
    %115 = arith.mulf %105, %114 : vector<8x32xf32>
    %116 = arith.truncf %115 : vector<8x32xf32> to vector<8x32xbf16>
    %c0_42 = arith.constant 0 : index
    %c0_43 = arith.constant 0 : index
    %117 = vector.load %arg5[%c0_42, %c0_43] : memref<32x64xbf16, #tpu.memory_space<vmem>>, vector<32x64xbf16>
    %cst_44 = arith.constant dense<0.000000e+00> : vector<8x64xf32>
    %118 = tpu.matmul %116, %117, %cst_44 {dimension_numbers = #tpu.dot_dimension_numbers<[1], [0], [0], [1], [0, 0, 1, 1], [], []>} : vector<8x32xbf16>, vector<32x64xbf16>, vector<8x64xf32> -> vector<8x64xf32>
    %c0_45 = arith.constant 0 : index
    %c0_46 = arith.constant 0 : index
    %119 = vector.load %arg6[%c0_45, %c0_46] : memref<1x64xf32, #tpu.memory_space<vmem>>, vector<1x64xf32>
    %120 = vector.broadcast %119 : vector<1x64xf32> to vector<8x64xf32>
    %121 = arith.addf %118, %120 : vector<8x64xf32>
    %cst_47 = arith.constant 5.000000e-01 : f32
    %122 = vector.broadcast %cst_47 : f32 to vector<8x64xf32>
    %123 = arith.mulf %122, %121 : vector<8x64xf32>
    %cst_48 = arith.constant 0.707106769 : f32
    %124 = vector.broadcast %cst_48 : f32 to vector<8x64xf32>
    %125 = arith.mulf %121, %124 : vector<8x64xf32>
    %126 = math.erf %125 : vector<8x64xf32>
    %cst_49 = arith.constant 1.000000e+00 : f32
    %127 = vector.broadcast %cst_49 : f32 to vector<8x64xf32>
    %128 = arith.addf %127, %126 : vector<8x64xf32>
    %129 = arith.mulf %123, %128 : vector<8x64xf32>
    %130 = arith.truncf %129 : vector<8x64xf32> to vector<8x64xbf16>
    %c0_50 = arith.constant 0 : index
    %c0_51 = arith.constant 0 : index
    %131 = vector.load %arg7[%c0_50, %c0_51] : memref<64x32xbf16, #tpu.memory_space<vmem>>, vector<64x32xbf16>
    %cst_52 = arith.constant dense<0.000000e+00> : vector<8x32xf32>
    %132 = tpu.matmul %130, %131, %cst_52 {dimension_numbers = #tpu.dot_dimension_numbers<[1], [0], [0], [1], [0, 0, 1, 1], [], []>} : vector<8x64xbf16>, vector<64x32xbf16>, vector<8x32xf32> -> vector<8x32xf32>
    %c0_53 = arith.constant 0 : index
    %c0_54 = arith.constant 0 : index
    %133 = vector.load %arg8[%c0_53, %c0_54] : memref<1x32xf32, #tpu.memory_space<vmem>>, vector<1x32xf32>
    %134 = vector.broadcast %133 : vector<1x32xf32> to vector<8x32xf32>
    %135 = arith.addf %132, %134 : vector<8x32xf32>
    %136 = arith.addf %98, %135 : vector<8x32xf32>
    %c0_55 = arith.constant 0 : index
    %c0_56 = arith.constant 0 : index
    %c0_57 = arith.constant 0 : index
    %137 = vector.load %arg9[%c0_55, %c0_56, %c0_57] : memref<1x8x32xf32, #tpu.memory_space<vmem>>, vector<1x8x32xf32>
    %138 = vector.shape_cast %137 : vector<1x8x32xf32> to vector<8x32xf32>
    %139 = vector.shape_cast %136 : vector<8x32xf32> to vector<1x8x32xf32>
    tpu.vector_store %arg9[%c0_55, %c0_56, %c0_57], %139 {strides = array<i32>} : memref<1x8x32xf32, #tpu.memory_space<vmem>>, vector<1x8x32xf32>,
    return
  }
  func.func @transform_0(%arg0: i32) -> (i32, i32, i32) {
    %c0_i32 = arith.constant 0 : i32
    %c0_i32_0 = arith.constant 0 : i32
    %c0_i32_1 = arith.constant 0 : i32
    return %arg0, %c0_i32, %c0_i32_0 : i32, i32, i32
  }
  func.func @transform_1(%arg0: i32) -> (i32, i32) {
    %c0_i32 = arith.constant 0 : i32
    %c0_i32_0 = arith.constant 0 : i32
    %c0_i32_1 = arith.constant 0 : i32
    return %c0_i32, %c0_i32_0 : i32, i32
  }
  func.func @transform_2(%arg0: i32) -> (i32, i32) {
    %c0_i32 = arith.constant 0 : i32
    %c0_i32_0 = arith.constant 0 : i32
    %c0_i32_1 = arith.constant 0 : i32
    return %c0_i32, %c0_i32_0 : i32, i32
  }
  func.func @transform_3(%arg0: i32) -> (i32, i32) {
    %c0_i32 = arith.constant 0 : i32
    %c0_i32_0 = arith.constant 0 : i32
    %c0_i32_1 = arith.constant 0 : i32
    return %c0_i32, %c0_i32_0 : i32, i32
  }
  func.func @transform_4(%arg0: i32) -> (i32, i32) {
    %c0_i32 = arith.constant 0 : i32
    %c0_i32_0 = arith.constant 0 : i32
    %c0_i32_1 = arith.constant 0 : i32
    return %c0_i32, %c0_i32_0 : i32, i32
  }
  func.func @transform_5(%arg0: i32) -> (i32, i32) {
    %c0_i32 = arith.constant 0 : i32
    %c0_i32_0 = arith.constant 0 : i32
    %c0_i32_1 = arith.constant 0 : i32
    return %c0_i32, %c0_i32_0 : i32, i32
  }
  func.func @transform_6(%arg0: i32) -> (i32, i32) {
    %c0_i32 = arith.constant 0 : i32
    %c0_i32_0 = arith.constant 0 : i32
    %c0_i32_1 = arith.constant 0 : i32
    return %c0_i32, %c0_i32_0 : i32, i32
  }
  func.func @transform_7(%arg0: i32) -> (i32, i32) {
    %c0_i32 = arith.constant 0 : i32
    %c0_i32_0 = arith.constant 0 : i32
    %c0_i32_1 = arith.constant 0 : i32
    return %c0_i32, %c0_i32_0 : i32, i32
  }
  func.func @transform_8(%arg0: i32) -> (i32, i32, i32) {
    %c0_i32 = arith.constant 0 : i32
    %c0_i32_0 = arith.constant 0 : i32
    %c0_i32_1 = arith.constant 0 : i32
    return %arg0, %c0_i32, %c0_i32_0 : i32, i32, i32
  }
}

module attributes {stable_mosaic.version = 11 : i64} {
  func.func @transformer_block_kernel(%arg0: i32, %arg1: memref<1x8x32xf32, #tpu.memory_space<vmem>>, %arg2: memref<32x96xbf16, #tpu.memory_space<vmem>>, %arg3: memref<32x32xbf16, #tpu.memory_space<vmem>>, %arg4: memref<1x32xf32, #tpu.memory_space<vmem>>, %arg5: memref<32x64xbf16, #tpu.memory_space<vmem>>, %arg6: memref<1x64xf32, #tpu.memory_space<vmem>>, %arg7: memref<64x32xbf16, #tpu.memory_space<vmem>>, %arg8: memref<1x32xf32, #tpu.memory_space<vmem>>, %arg9: memref<1x8x32xf32, #tpu.memory_space<vmem>>, %arg10: memref<8x32xf32, #tpu.memory_space<vmem>>) attributes {dimension_semantics = [#tpu.dimension_semantics<parallel>], iteration_bounds = array<i64: 2>, scalar_prefetch = 0 : i64, scratch_operands = 1 : i64, tpu.core_type = #tpu.core_type<tc>, window_params = [{transform_indices = @transform_0, window_bounds = array<i64: 1, 8, 32>}, {pipeline_mode = #tpu.pipeline_mode<synchronous>, transform_indices = @transform_1, window_bounds = array<i64: 32, 96>}, {pipeline_mode = #tpu.pipeline_mode<synchronous>, transform_indices = @transform_2, window_bounds = array<i64: 32, 32>}, {pipeline_mode = #tpu.pipeline_mode<synchronous>, transform_indices = @transform_3, window_bounds = array<i64: 1, 32>}, {pipeline_mode = #tpu.pipeline_mode<synchronous>, transform_indices = @transform_4, window_bounds = array<i64: 32, 64>}, {pipeline_mode = #tpu.pipeline_mode<synchronous>, transform_indices = @transform_5, window_bounds = array<i64: 1, 64>}, {pipeline_mode = #tpu.pipeline_mode<synchronous>, transform_indices = @transform_6, window_bounds = array<i64: 64, 32>}, {pipeline_mode = #tpu.pipeline_mode<synchronous>, transform_indices = @transform_7, window_bounds = array<i64: 1, 32>}, {transform_indices = @transform_8, window_bounds = array<i64: 1, 8, 32>}]} {
    %c0 = arith.constant 0 : index
    %c0_0 = arith.constant 0 : index
    %c0_1 = arith.constant 0 : index
    %0 = vector.load %arg1[%c0, %c0_0, %c0_1] : memref<1x8x32xf32, #tpu.memory_space<vmem>>, vector<1x8x32xf32>
    %1 = vector.shape_cast %0 : vector<1x8x32xf32> to vector<8x32xf32>
    %2 = vector.shape_cast %1 : vector<8x32xf32> to vector<1x8x32xf32>
    %cst = arith.constant dense<0.000000e+00> : vector<1xf32>
    %3 = vector.multi_reduction <add>, %2, %cst [1, 2] : vector<1x8x32xf32> to vector<1xf32>
    %4 = vector.shape_cast %3 : vector<1xf32> to vector<1x1x1xf32>
    %5 = vector.extract %4[0, 0, 0] : f32 from vector<1x1x1xf32>
    %cst_2 = arith.constant 2.560000e+02 : f32
    %6 = arith.divf %5, %cst_2 : f32
    %7 = vector.broadcast %6 : f32 to vector<8x32xf32>
    %8 = arith.subf %1, %7 : vector<8x32xf32>
    %9 = arith.mulf %8, %8 : vector<8x32xf32>
    %10 = vector.shape_cast %9 : vector<8x32xf32> to vector<1x8x32xf32>
    %cst_3 = arith.constant dense<0.000000e+00> : vector<1xf32>
    %11 = vector.multi_reduction <add>, %10, %cst_3 [1, 2] : vector<1x8x32xf32> to vector<1xf32>
    %12 = vector.shape_cast %11 : vector<1xf32> to vector<1x1x1xf32>
    %13 = vector.extract %12[0, 0, 0] : f32 from vector<1x1x1xf32>
    %cst_4 = arith.constant 2.560000e+02 : f32
    %14 = arith.divf %13, %cst_4 : f32
    %cst_5 = arith.constant 9.99999974E-6 : f32
    %15 = arith.addf %14, %cst_5 : f32
    %16 = math.rsqrt %15 : f32
    %17 = vector.broadcast %16 : f32 to vector<8x32xf32>
    %18 = arith.mulf %8, %17 : vector<8x32xf32>
    %19 = arith.truncf %18 : vector<8x32xf32> to vector<8x32xbf16>
    %c0_6 = arith.constant 0 : index
    %c0_7 = arith.constant 0 : index
    %20 = vector.load %arg2[%c0_6, %c0_7] : memref<32x96xbf16, #tpu.memory_space<vmem>>, vector<32x96xbf16>
    %cst_8 = arith.constant dense<0.000000e+00> : vector<8x96xf32>
    %21 = tpu.matmul %19, %20, %cst_8 {dimension_numbers = #tpu.dot_dimension_numbers<[1], [0], [0], [1], [0, 0, 1, 1], [], []>} : vector<8x32xbf16>, vector<32x96xbf16>, vector<8x96xf32> -> vector<8x96xf32>
    %22 = arith.truncf %21 : vector<8x96xf32> to vector<8x96xbf16>
    %23 = vector.extract_strided_slice %22 {offsets = [0, 0], sizes = [8, 8], strides = [1, 1]} : vector<8x96xbf16> to vector<8x8xbf16>
    %24 = vector.extract_strided_slice %22 {offsets = [0, 32], sizes = [8, 8], strides = [1, 1]} : vector<8x96xbf16> to vector<8x8xbf16>
    %25 = vector.extract_strided_slice %22 {offsets = [0, 64], sizes = [8, 8], strides = [1, 1]} : vector<8x96xbf16> to vector<8x8xbf16>
    %cst_9 = arith.constant dense<0.000000e+00> : vector<8x8xf32>
    %26 = tpu.matmul %23, %24, %cst_9 {dimension_numbers = #tpu.dot_dimension_numbers<[1], [1], [0], [0], [0, 0, 1, 0], [], []>} : vector<8x8xbf16>, vector<8x8xbf16>, vector<8x8xf32> -> vector<8x8xf32>
    %cst_10 = arith.constant dense<0xFF800000> : vector<8xf32>
    %27 = vector.multi_reduction <maximumf>, %26, %cst_10 [1] : vector<8x8xf32> to vector<8xf32>
    %28 = vector.shape_cast %27 : vector<8xf32> to vector<8x1xf32>
    %29 = vector.broadcast %28 : vector<8x1xf32> to vector<8x8xf32>
    %30 = arith.subf %26, %29 : vector<8x8xf32>
    %31 = math.exp %30 : vector<8x8xf32>
    %cst_11 = arith.constant dense<0.000000e+00> : vector<8xf32>
    %32 = vector.multi_reduction <add>, %31, %cst_11 [1] : vector<8x8xf32> to vector<8xf32>
    %33 = vector.shape_cast %32 : vector<8xf32> to vector<8x1xf32>
    %34 = tpu.reciprocal %33 {approx = true} : vector<8x1xf32> -> vector<8x1xf32>
    %35 = vector.broadcast %34 : vector<8x1xf32> to vector<8x8xf32>
    %36 = arith.mulf %31, %35 : vector<8x8xf32>
    %37 = arith.truncf %36 : vector<8x8xf32> to vector<8x8xbf16>
    %cst_12 = arith.constant dense<0.000000e+00> : vector<8x8xf32>
    %38 = tpu.matmul %37, %25, %cst_12 {dimension_numbers = #tpu.dot_dimension_numbers<[1], [0], [0], [1], [0, 0, 1, 1], [], []>} : vector<8x8xbf16>, vector<8x8xbf16>, vector<8x8xf32> -> vector<8x8xf32>
    %c0_13 = arith.constant 0 : index
    %c0_14 = arith.constant 0 : index
    %39 = vector.load %arg10[%c0_13, %c0_14] : memref<8x32xf32, #tpu.memory_space<vmem>>, vector<8x8xf32>
    tpu.vector_store %arg10[%c0_13, %c0_14], %38 {strides = array<i32>} : memref<8x32xf32, #tpu.memory_space<vmem>>, vector<8x8xf32>,
    %40 = vector.extract_strided_slice %22 {offsets = [0, 8], sizes = [8, 8], strides = [1, 1]} : vector<8x96xbf16> to vector<8x8xbf16>
    %41 = vector.extract_strided_slice %22 {offsets = [0, 40], sizes = [8, 8], strides = [1, 1]} : vector<8x96xbf16> to vector<8x8xbf16>
    %42 = vector.extract_strided_slice %22 {offsets = [0, 72], sizes = [8, 8], strides = [1, 1]} : vector<8x96xbf16> to vector<8x8xbf16>
    %cst_15 = arith.constant dense<0.000000e+00> : vector<8x8xf32>
    %43 = tpu.matmul %40, %41, %cst_15 {dimension_numbers = #tpu.dot_dimension_numbers<[1], [1], [0], [0], [0, 0, 1, 0], [], []>} : vector<8x8xbf16>, vector<8x8xbf16>, vector<8x8xf32> -> vector<8x8xf32>
    %cst_16 = arith.constant dense<0xFF800000> : vector<8xf32>
    %44 = vector.multi_reduction <maximumf>, %43, %cst_16 [1] : vector<8x8xf32> to vector<8xf32>
    %45 = vector.shape_cast %44 : vector<8xf32> to vector<8x1xf32>
    %46 = vector.broadcast %45 : vector<8x1xf32> to vector<8x8xf32>
    %47 = arith.subf %43, %46 : vector<8x8xf32>
    %48 = math.exp %47 : vector<8x8xf32>
    %cst_17 = arith.constant dense<0.000000e+00> : vector<8xf32>
    %49 = vector.multi_reduction <add>, %48, %cst_17 [1] : vector<8x8xf32> to vector<8xf32>
    %50 = vector.shape_cast %49 : vector<8xf32> to vector<8x1xf32>
    %51 = tpu.reciprocal %50 {approx = true} : vector<8x1xf32> -> vector<8x1xf32>
    %52 = vector.broadcast %51 : vector<8x1xf32> to vector<8x8xf32>
    %53 = arith.mulf %48, %52 : vector<8x8xf32>
    %54 = arith.truncf %53 : vector<8x8xf32> to vector<8x8xbf16>
    %cst_18 = arith.constant dense<0.000000e+00> : vector<8x8xf32>
    %55 = tpu.matmul %54, %42, %cst_18 {dimension_numbers = #tpu.dot_dimension_numbers<[1], [0], [0], [1], [0, 0, 1, 1], [], []>} : vector<8x8xbf16>, vector<8x8xbf16>, vector<8x8xf32> -> vector<8x8xf32>
    %c0_19 = arith.constant 0 : index
    %c8 = arith.constant 8 : index
    %56 = vector.load %arg10[%c0_19, %c8] : memref<8x32xf32, #tpu.memory_space<vmem>>, vector<8x8xf32>
    tpu.vector_store %arg10[%c0_19, %c8], %55 {strides = array<i32>} : memref<8x32xf32, #tpu.memory_space<vmem>>, vector<8x8xf32>,
    %57 = vector.extract_strided_slice %22 {offsets = [0, 16], sizes = [8, 8], strides = [1, 1]} : vector<8x96xbf16> to vector<8x8xbf16>
    %58 = vector.extract_strided_slice %22 {offsets = [0, 48], sizes = [8, 8], strides = [1, 1]} : vector<8x96xbf16> to vector<8x8xbf16>
    %59 = vector.extract_strided_slice %22 {offsets = [0, 80], sizes = [8, 8], strides = [1, 1]} : vector<8x96xbf16> to vector<8x8xbf16>
    %cst_20 = arith.constant dense<0.000000e+00> : vector<8x8xf32>
    %60 = tpu.matmul %57, %58, %cst_20 {dimension_numbers = #tpu.dot_dimension_numbers<[1], [1], [0], [0], [0, 0, 1, 0], [], []>} : vector<8x8xbf16>, vector<8x8xbf16>, vector<8x8xf32> -> vector<8x8xf32>
    %cst_21 = arith.constant dense<0xFF800000> : vector<8xf32>
    %61 = vector.multi_reduction <maximumf>, %60, %cst_21 [1] : vector<8x8xf32> to vector<8xf32>
    %62 = vector.shape_cast %61 : vector<8xf32> to vector<8x1xf32>
    %63 = vector.broadcast %62 : vector<8x1xf32> to vector<8x8xf32>
    %64 = arith.subf %60, %63 : vector<8x8xf32>
    %65 = math.exp %64 : vector<8x8xf32>
    %cst_22 = arith.constant dense<0.000000e+00> : vector<8xf32>
    %66 = vector.multi_reduction <add>, %65, %cst_22 [1] : vector<8x8xf32> to vector<8xf32>
    %67 = vector.shape_cast %66 : vector<8xf32> to vector<8x1xf32>
    %68 = tpu.reciprocal %67 {approx = true} : vector<8x1xf32> -> vector<8x1xf32>
    %69 = vector.broadcast %68 : vector<8x1xf32> to vector<8x8xf32>
    %70 = arith.mulf %65, %69 : vector<8x8xf32>
    %71 = arith.truncf %70 : vector<8x8xf32> to vector<8x8xbf16>
    %cst_23 = arith.constant dense<0.000000e+00> : vector<8x8xf32>
    %72 = tpu.matmul %71, %59, %cst_23 {dimension_numbers = #tpu.dot_dimension_numbers<[1], [0], [0], [1], [0, 0, 1, 1], [], []>} : vector<8x8xbf16>, vector<8x8xbf16>, vector<8x8xf32> -> vector<8x8xf32>
    %c0_24 = arith.constant 0 : index
    %c16 = arith.constant 16 : index
    %73 = vector.load %arg10[%c0_24, %c16] : memref<8x32xf32, #tpu.memory_space<vmem>>, vector<8x8xf32>
    tpu.vector_store %arg10[%c0_24, %c16], %72 {strides = array<i32>} : memref<8x32xf32, #tpu.memory_space<vmem>>, vector<8x8xf32>,
    %74 = vector.extract_strided_slice %22 {offsets = [0, 24], sizes = [8, 8], strides = [1, 1]} : vector<8x96xbf16> to vector<8x8xbf16>
    %75 = vector.extract_strided_slice %22 {offsets = [0, 56], sizes = [8, 8], strides = [1, 1]} : vector<8x96xbf16> to vector<8x8xbf16>
    %76 = vector.extract_strided_slice %22 {offsets = [0, 88], sizes = [8, 8], strides = [1, 1]} : vector<8x96xbf16> to vector<8x8xbf16>
    %cst_25 = arith.constant dense<0.000000e+00> : vector<8x8xf32>
    %77 = tpu.matmul %74, %75, %cst_25 {dimension_numbers = #tpu.dot_dimension_numbers<[1], [1], [0], [0], [0, 0, 1, 0], [], []>} : vector<8x8xbf16>, vector<8x8xbf16>, vector<8x8xf32> -> vector<8x8xf32>
    %cst_26 = arith.constant dense<0xFF800000> : vector<8xf32>
    %78 = vector.multi_reduction <maximumf>, %77, %cst_26 [1] : vector<8x8xf32> to vector<8xf32>
    %79 = vector.shape_cast %78 : vector<8xf32> to vector<8x1xf32>
    %80 = vector.broadcast %79 : vector<8x1xf32> to vector<8x8xf32>
    %81 = arith.subf %77, %80 : vector<8x8xf32>
    %82 = math.exp %81 : vector<8x8xf32>
    %cst_27 = arith.constant dense<0.000000e+00> : vector<8xf32>
    %83 = vector.multi_reduction <add>, %82, %cst_27 [1] : vector<8x8xf32> to vector<8xf32>
    %84 = vector.shape_cast %83 : vector<8xf32> to vector<8x1xf32>
    %85 = tpu.reciprocal %84 {approx = true} : vector<8x1xf32> -> vector<8x1xf32>
    %86 = vector.broadcast %85 : vector<8x1xf32> to vector<8x8xf32>
    %87 = arith.mulf %82, %86 : vector<8x8xf32>
    %88 = arith.truncf %87 : vector<8x8xf32> to vector<8x8xbf16>
    %cst_28 = arith.constant dense<0.000000e+00> : vector<8x8xf32>
    %89 = tpu.matmul %88, %76, %cst_28 {dimension_numbers = #tpu.dot_dimension_numbers<[1], [0], [0], [1], [0, 0, 1, 1], [], []>} : vector<8x8xbf16>, vector<8x8xbf16>, vector<8x8xf32> -> vector<8x8xf32>
    %c0_29 = arith.constant 0 : index
    %c24 = arith.constant 24 : index
    %90 = vector.load %arg10[%c0_29, %c24] : memref<8x32xf32, #tpu.memory_space<vmem>>, vector<8x8xf32>
    tpu.vector_store %arg10[%c0_29, %c24], %89 {strides = array<i32>} : memref<8x32xf32, #tpu.memory_space<vmem>>, vector<8x8xf32>,
    %c0_30 = arith.constant 0 : index
    %c0_31 = arith.constant 0 : index
    %91 = vector.load %arg10[%c0_30, %c0_31] : memref<8x32xf32, #tpu.memory_space<vmem>>, vector<8x32xf32>
    %92 = arith.truncf %91 : vector<8x32xf32> to vector<8x32xbf16>
    %c0_32 = arith.constant 0 : index
    %c0_33 = arith.constant 0 : index
    %93 = vector.load %arg3[%c0_32, %c0_33] : memref<32x32xbf16, #tpu.memory_space<vmem>>, vector<32x32xbf16>
    %cst_34 = arith.constant dense<0.000000e+00> : vector<8x32xf32>
    %94 = tpu.matmul %92, %93, %cst_34 {dimension_numbers = #tpu.dot_dimension_numbers<[1], [0], [0], [1], [0, 0, 1, 1], [], []>} : vector<8x32xbf16>, vector<32x32xbf16>, vector<8x32xf32> -> vector<8x32xf32>
    %c0_35 = arith.constant 0 : index
    %c0_36 = arith.constant 0 : index
    %95 = vector.load %arg4[%c0_35, %c0_36] : memref<1x32xf32, #tpu.memory_space<vmem>>, vector<1x32xf32>
    %96 = vector.broadcast %95 : vector<1x32xf32> to vector<8x32xf32>
    %97 = arith.addf %94, %96 : vector<8x32xf32>
    %98 = arith.addf %1, %97 : vector<8x32xf32>
    %99 = vector.shape_cast %98 : vector<8x32xf32> to vector<1x8x32xf32>
    %cst_37 = arith.constant dense<0.000000e+00> : vector<1xf32>
    %100 = vector.multi_reduction <add>, %99, %cst_37 [1, 2] : vector<1x8x32xf32> to vector<1xf32>
    %101 = vector.shape_cast %100 : vector<1xf32> to vector<1x1x1xf32>
    %102 = vector.extract %101[0, 0, 0] : f32 from vector<1x1x1xf32>
    %cst_38 = arith.constant 2.560000e+02 : f32
    %103 = arith.divf %102, %cst_38 : f32
    %104 = vector.broadcast %103 : f32 to vector<8x32xf32>
    %105 = arith.subf %98, %104 : vector<8x32xf32>
    %106 = arith.mulf %105, %105 : vector<8x32xf32>
    %107 = vector.shape_cast %106 : vector<8x32xf32> to vector<1x8x32xf32>
    %cst_39 = arith.constant dense<0.000000e+00> : vector<1xf32>
    %108 = vector.multi_reduction <add>, %107, %cst_39 [1, 2] : vector<1x8x32xf32> to vector<1xf32>
    %109 = vector.shape_cast %108 : vector<1xf32> to vector<1x1x1xf32>
    %110 = vector.extract %109[0, 0, 0] : f32 from vector<1x1x1xf32>
    %cst_40 = arith.constant 2.560000e+02 : f32
    %111 = arith.divf %110, %cst_40 : f32
    %cst_41 = arith.constant 9.99999974E-6 : f32
    %112 = arith.addf %111, %cst_41 : f32
    %113 = math.rsqrt %112 : f32
    %114 = vector.broadcast %113 : f32 to vector<8x32xf32>
    %115 = arith.mulf %105, %114 : vector<8x32xf32>
    %116 = arith.truncf %115 : vector<8x32xf32> to vector<8x32xbf16>
    %c0_42 = arith.constant 0 : index
    %c0_43 = arith.constant 0 : index
    %117 = vector.load %arg5[%c0_42, %c0_43] : memref<32x64xbf16, #tpu.memory_space<vmem>>, vector<32x64xbf16>
    %cst_44 = arith.constant dense<0.000000e+00> : vector<8x64xf32>
    %118 = tpu.matmul %116, %117, %cst_44 {dimension_numbers = #tpu.dot_dimension_numbers<[1], [0], [0], [1], [0, 0, 1, 1], [], []>} : vector<8x32xbf16>, vector<32x64xbf16>, vector<8x64xf32> -> vector<8x64xf32>
    %c0_45 = arith.constant 0 : index
    %c0_46 = arith.constant 0 : index
    %119 = vector.load %arg6[%c0_45, %c0_46] : memref<1x64xf32, #tpu.memory_space<vmem>>, vector<1x64xf32>
    %120 = vector.broadcast %119 : vector<1x64xf32> to vector<8x64xf32>
    %121 = arith.addf %118, %120 : vector<8x64xf32>
    %cst_47 = arith.constant 5.000000e-01 : f32
    %122 = vector.broadcast %cst_47 : f32 to vector<8x64xf32>
    %123 = arith.mulf %122, %121 : vector<8x64xf32>
    %cst_48 = arith.constant 0.707106769 : f32
    %124 = vector.broadcast %cst_48 : f32 to vector<8x64xf32>
    %125 = arith.mulf %121, %124 : vector<8x64xf32>
    %126 = math.erf %125 : vector<8x64xf32>
    %cst_49 = arith.constant 1.000000e+00 : f32
    %127 = vector.broadcast %cst_49 : f32 to vector<8x64xf32>
    %128 = arith.addf %127, %126 : vector<8x64xf32>
    %129 = arith.mulf %123, %128 : vector<8x64xf32>
    %130 = arith.truncf %129 : vector<8x64xf32> to vector<8x64xbf16>
    %c0_50 = arith.constant 0 : index
    %c0_51 = arith.constant 0 : index
    %131 = vector.load %arg7[%c0_50, %c0_51] : memref<64x32xbf16, #tpu.memory_space<vmem>>, vector<64x32xbf16>
    %cst_52 = arith.constant dense<0.000000e+00> : vector<8x32xf32>
    %132 = tpu.matmul %130, %131, %cst_52 {dimension_numbers = #tpu.dot_dimension_numbers<[1], [0], [0], [1], [0, 0, 1, 1], [], []>} : vector<8x64xbf16>, vector<64x32xbf16>, vector<8x32xf32> -> vector<8x32xf32>
    %c0_53 = arith.constant 0 : index
    %c0_54 = arith.constant 0 : index
    %133 = vector.load %arg8[%c0_53, %c0_54] : memref<1x32xf32, #tpu.memory_space<vmem>>, vector<1x32xf32>
    %134 = vector.broadcast %133 : vector<1x32xf32> to vector<8x32xf32>
    %135 = arith.addf %132, %134 : vector<8x32xf32>
    %136 = arith.addf %98, %135 : vector<8x32xf32>
    %c0_55 = arith.constant 0 : index
    %c0_56 = arith.constant 0 : index
    %c0_57 = arith.constant 0 : index
    %137 = vector.load %arg9[%c0_55, %c0_56, %c0_57] : memref<1x8x32xf32, #tpu.memory_space<vmem>>, vector<1x8x32xf32>
    %138 = vector.shape_cast %137 : vector<1x8x32xf32> to vector<8x32xf32>
    %139 = vector.shape_cast %136 : vector<8x32xf32> to vector<1x8x32xf32>
    tpu.vector_store %arg9[%c0_55, %c0_56, %c0_57], %139 {strides = array<i32>} : memref<1x8x32xf32, #tpu.memory_space<vmem>>, vector<1x8x32xf32>,
    return
  }
  func.func @transform_0(%arg0: i32) -> (i32, i32, i32) {
    %c0_i32 = arith.constant 0 : i32
    %c0_i32_0 = arith.constant 0 : i32
    %c0_i32_1 = arith.constant 0 : i32
    return %arg0, %c0_i32, %c0_i32_0 : i32, i32, i32
  }
  func.func @transform_1(%arg0: i32) -> (i32, i32) {
    %c0_i32 = arith.constant 0 : i32
    %c0_i32_0 = arith.constant 0 : i32
    %c0_i32_1 = arith.constant 0 : i32
    return %c0_i32, %c0_i32_0 : i32, i32
  }
  func.func @transform_2(%arg0: i32) -> (i32, i32) {
    %c0_i32 = arith.constant 0 : i32
    %c0_i32_0 = arith.constant 0 : i32
    %c0_i32_1 = arith.constant 0 : i32
    return %c0_i32, %c0_i32_0 : i32, i32
  }
  func.func @transform_3(%arg0: i32) -> (i32, i32) {
    %c0_i32 = arith.constant 0 : i32
    %c0_i32_0 = arith.constant 0 : i32
    %c0_i32_1 = arith.constant 0 : i32
    return %c0_i32, %c0_i32_0 : i32, i32
  }
  func.func @transform_4(%arg0: i32) -> (i32, i32) {
    %c0_i32 = arith.constant 0 : i32
    %c0_i32_0 = arith.constant 0 : i32
    %c0_i32_1 = arith.constant 0 : i32
    return %c0_i32, %c0_i32_0 : i32, i32
  }
  func.func @transform_5(%arg0: i32) -> (i32, i32) {
    %c0_i32 = arith.constant 0 : i32
    %c0_i32_0 = arith.constant 0 : i32
    %c0_i32_1 = arith.constant 0 : i32
    return %c0_i32, %c0_i32_0 : i32, i32
  }
  func.func @transform_6(%arg0: i32) -> (i32, i32) {
    %c0_i32 = arith.constant 0 : i32
    %c0_i32_0 = arith.constant 0 : i32
    %c0_i32_1 = arith.constant 0 : i32
    return %c0_i32, %c0_i32_0 : i32, i32
  }
  func.func @transform_7(%arg0: i32) -> (i32, i32) {
    %c0_i32 = arith.constant 0 : i32
    %c0_i32_0 = arith.constant 0 : i32
    %c0_i32_1 = arith.constant 0 : i32
    return %c0_i32, %c0_i32_0 : i32, i32
  }
  func.func @transform_8(%arg0: i32) -> (i32, i32, i32) {
    %c0_i32 = arith.constant 0 : i32
    %c0_i32_0 = arith.constant 0 : i32
    %c0_i32_1 = arith.constant 0 : i32
    return %arg0, %c0_i32, %c0_i32_0 : i32, i32, i32
  }
}

</mosaic_0001>

<bundles_post_ra>
// kernel: _transformer_block_impl.1
= control target key start
LH: loop header
LB: loop body
LE: loop exit
PB: predicated region body
PF: predicated region fallthrough
CT: control target
= control target key end

     0   :  { %13 = vsyncpa [#allocation4], 0  ;;  %s1497_s0 = inlined_call_operand.vmem [shape: f32[2,8,32], index: 0, kind: input, shape index: {}]   ;;  %s1498_s1 = inlined_call_operand.vmem [shape: bf16[32,96], index: 1, kind: input, shape index: {}]   ;;  %s1499_s2 = inlined_call_operand.vmem [shape: bf16[32,32], index: 2, kind: input, shape index: {}]   ;;  %s1500_s3 = inlined_call_operand.vmem [shape: f32[1,32], index: 3, kind: input, shape index: {}]   ;;  %s1501_s4 = inlined_call_operand.hbm [shape: bf16[32,64], index: 4, kind: input, shape index: {}]   ;;  %s1502_s5 = inlined_call_operand.vmem [shape: f32[1,64], index: 5, kind: input, shape index: {}]   ;;  %s1503_s6 = inlined_call_operand.vmem [shape: bf16[64,32], index: 6, kind: input, shape index: {}]   ;;  %s1504_s7 = inlined_call_operand.vmem [shape: f32[1,32], index: 7, kind: input, shape index: {}]   ;;  %s1505_s8 = inlined_call_operand.hbm [shape: f32[2,8,32], index: 8, kind: output, shape index: {}]  }
   0x1   :  { %14 = vsyncpa [#allocation5], 0 }
   0x2   :  { %16 = vsyncpa [#allocation5 + $0x1], 0  ;;  %s1320_s27 = smov 0   ;;  %s1322_s28 = smov 0  }
   0x3   :  { %s1324_s29 = smov 0   ;;  %s1326_s30 = smov 0  }
   0x4 LB: > { %s1341_s9 = sadd.s32 4294967295, %s1255_s30   ;;  %s976_s10 = sadd.s32 4294967294, %s1255_s30   ;;  %s1255_s30 = sphi %s1326_s30, %s1511_s30   ;;  %s1251_s29 = sphi %s1324_s29, %s1510_s29   ;;  %s1247_s28 = sphi %s1322_s28, %s1509_s28   ;;  %s1243_s27 = sphi %s1320_s27, %s1508_s27  }
   0x5   : > { %s1345_s11 = sadd.s32 1, %s1255_s30   ;;  %s202_s12 = sadd.s32 1, %s1251_s29 }
   0x6   : > { %s199_s13 = ssub.s32 %s1255_s30, %s1345_s11  ;;  %p212_p0 = scmp.ne.s32.totalorder %s1251_s29, %s1247_s28 }
   0x7   : > { %p200_p1 = scmp.eq.s32.totalorder %s199_s13, 0  ;;  %p213_p2 = scmp.eq.s32.totalorder %s1341_s9, 1 }
   0x8   : > { %p218_p3 = scmp.ne.s32.totalorder %s1247_s28, %s1243_s27  ;;  %p219_p4 = scmp.eq.s32.totalorder %s976_s10, 1 }
   0x9   : > { %s1356_s14 = scalar_select %p200_p1, %s1251_s29, %s202_s12  }
   0xa   : > { %p1358_p5 = por %p213_p2, %p212_p0  ;;  %p1362_p6 = por %p219_p4, %p218_p3 }
   0xb   : > { %p977_p7 = scmp.ge.s32.totalorder %s1255_s30, 1  ;;  %p226_p8 = scmp.lt.s32.totalorder %s1255_s30, 3 }
   0xc   : > { %p1079_p9 = scmp.eq.s32.totalorder %s1341_s9, 0  ;;  %s246_s19 = sshll.u32 %s1501_s4, 4  ;;  %s247_s19 = int_to_ptr.hbm [resolvable:$true] %s246_s19 }
   0xd   : > { %p227_p10 = pnand %p977_p7, %p226_p8  ;;  %s1257_s20 = smov [#allocation3]  }
   0xe   : > { %s248_s21 = sshll.u32 %s1257_s20, 4  ;;  %s1258_s22 = smov 64   ;;  %s249_s21 = int_to_ptr.vmem [resolvable:$true] %s248_s21 }
   0xf   : > { %p1071_p11 = pneg %p227_p10  ;;  %s1259_s23 = smov 4  }
  0x10   : > { %280 = sbr.rel (%p227_p10) target bundleno = 2294 (0x8f6), region = 52 }
  0x11   : > { %p1072_p12 = pnand %p1079_p9, %p1071_p11 }
  0x13   : > { %1074 = dma.hbm_to_vmem [thread:$0]  (!%p1072_p12), %s247_s19, 256, %s249_s21, [#allocation4], %s1258_s22, %s1258_s22, %s1259_s23  }
  0x15   : > { %1234 = dma.done.wait (%p1079_p9), [#allocation4], 256  }
  0x16   : > { %1236 = vsyncadd (%p1079_p9), [#allocation4], 4294967040  ;;  %p314_p13 = scmp.lt.s32.totalorder %s1341_s9, 1  ;;  %vm320_vm0 = vcmask 261120   ;;  %v1260_v2 = vmov 256.0   ;;  %v1042_v27 = vld [vmem:[%s1498_s1 + $0x8] sm:$0xff] }
  0x17   : > { %1135 = vrcp.f32 %v1260_v2  ;;  %403 = vmatpush.bf16.msra.mxu0 %v1042_v27  ;;  %v1041_v36 = vld [vmem:[%s1498_s1] sm:$0xff]  ;;  %s1261_s10 = smov 104   ;;  %s1265_s19 = smov 88   ;;  %vm416_vm5 = vcmask 64512   ;;  %vm453_vm6 = vcmask 1043456   ;;  %vm531_vm7 = vcmask 130112  }
  0x18   : > { %s315_s24 = scalar_select %p314_p13, %s1341_s9, 1  ;;  %vm593_vm8 = vcmask 195712   ;;  %vm655_vm9 = vcmask 261312  }
  0x19   : > { %s1266_s20 = smov 112  }
  0x1a   : > { %s983_s25 = sshll.u32 %s315_s24, 3  ;;  %s1270_s24 = smov 40  }
  0x1b   : > { %s317_s12 = scalar_lea.vmem %s1497_s0, %s983_s25  ;;  %404 = vmatpush.bf16.msra.mxu0 %v1041_v36  ;;  %s1271_s25 = smov 48  }
  0x1c   : > { %v1383_v0 = vld [vmem:[%s317_s12] sm:$0xff]  ;;  %s1262_s12 = smov 120  }
  0x1d   : > { %v321_v1 = vsel %vm320_vm0, %v1383_v0, 0.0  ;;  %v1136_v3 = vpop.eup %1135 }
  0x1e   : > { %322 = vadd.xlane.f32.xlu0 %v321_v1  ;;  %v332_v4 = vmul.f32 256.0, %v1136_v3  ;;  %vm336_vm1 = vweird.f32 %v1136_v3 }
  0x20   : > { %v333_v5 = vsub.f32 1.0, %v332_v4 }
  0x22   : > { %v334_v9 = vmul.f32 %v1136_v3, %v333_v5 }
  0x24   : > { %v335_v12 = vadd.f32 %v1136_v3, %v334_v9 }
  0x26   : > { %v337_v15 = vsel %vm336_vm1, %v1136_v3, %v335_v12 }
  0x91   : > { %v323_v6 = vpop.xlane.xlu0 %322 }
  0x92   : > { %v324_v7 = vrot.slane %v323_v6, 4 }
  0x94   : > { %v325_v8 = vadd.f32 %v324_v7, %v323_v6 }
  0x96   : > { %v326_v10 = vrot.slane %v325_v8, 2 }
  0x98   : > { %v327_v11 = vadd.f32 %v326_v10, %v325_v8 }
  0x9a   : > { %v328_v13 = vrot.slane %v327_v11, 1 }
  0x9c   : > { %v329_v14 = vadd.f32 %v328_v13, %v327_v11 }
  0x9e   : > { %1051 = vpush %v329_v14 }
  0x9f   : > { %1053 = vpush %v337_v15 }
  0xcf   : > { %s1052_s13 = spop %1051 }
  0xd0   : > { %s1387_s17 = spop %1053 }
  0xd1   : > { %s339_s18 = smul.f32 %s1387_s17, %s1052_s13  ;;  %s1263_s13 = smov 96  }
  0xd3   : > { %v340_v16 = vstv %s339_s18  ;;  %s1264_s18 = smov 72  }
  0xd4   : > { %v341_v17 = vsub.f32 %v1383_v0, %v340_v16 }
  0xd6   : > { %v342_v18 = vmul.f32 %v341_v17, %v341_v17 }
  0xd8   : > { %v343_v19 = vsel %vm320_vm0, %v342_v18, 0.0 }
  0xd9   : > { %344 = vadd.xlane.f32.xlu0 %v343_v19 }
 0x14c   : > { %v345_v20 = vpop.xlane.xlu0 %344 }
 0x14d   : > { %v346_v21 = vrot.slane %v345_v20, 4 }
 0x14f   : > { %v347_v22 = vadd.f32 %v346_v21, %v345_v20 }
 0x151   : > { %v348_v23 = vrot.slane %v347_v22, 2 }
 0x153   : > { %v349_v24 = vadd.f32 %v348_v23, %v347_v22 }
 0x155   : > { %v350_v25 = vrot.slane %v349_v24, 1 }
 0x157   : > { %v351_v26 = vadd.f32 %v350_v25, %v349_v24 }
 0x159   : > { %1055 = vpush %v351_v26 }
 0x18a   : > { %s1056_s21 = spop %1055 }
 0x18b   : > { %s361_s22 = smul.f32 %s1056_s21, %s1387_s17  ;;  %s1267_s21 = smov 80  }
 0x18d   : > { %s362_s23 = sadd.f32 1e-05, %s361_s22  ;;  %s1268_s22 = smov 64  }
 0x18f   : > { %v363_v28 = vstv %s362_s23  ;;  %s1269_s23 = smov 56  }
 0x190   : > { %1137 = vrsqrt.f32 %v363_v28  ;;  %vm370_vm3 = vweird.f32 %v363_v28 }
 0x196   : > { %v1138_v29 = vpop.eup %1137 }
 0x197   : > { %v365_v30 = vmul.f32 %v1138_v29, %v363_v28  ;;  %vm371_vm2 = vweird.f32 %v1138_v29 }
 0x198   : > { %vm372_vm4 = vmor %vm370_vm3, %vm371_vm2  ;;  %vm870_vm2 = vcmask 523264  }
 0x199   : > { %v366_v31 = vmul.f32 %v1138_v29, %v365_v30 }
 0x19b   : > { %v367_v32 = vmul.f32 0.5, %v366_v31 }
 0x19d   : > { %v368_v33 = vsub.f32 1.5, %v367_v32 }
 0x19f   : > { %v369_v34 = vmul.f32 %v1138_v29, %v368_v33 }
 0x1a1   : > { %v373_v35 = vsel %vm372_vm4, %v1138_v29, %v369_v34 }
 0x1a2   : > { %1057 = vpush %v373_v35 }
 0x1d3   : > { %s1058_s26 = spop %1057 }
 0x1d4   : > { %v375_v37 = vstv %s1058_s26  ;;  %s1272_s26 = smov 8  }
 0x1d5   : > { %v376_v38 = vmul.f32 %v375_v37, %v341_v17 }
 0x1d7   : > { %v377_v39 = vpack.c.bf16 %v376_v38, %v376_v38 }
 0x1d9   : > { %992 = vmatmul.msk.bf16.vlgmr.msra.gmra.mxu0 %vm320_vm0, %v377_v39 }
 0x256   : > { %v406_v40 = vpop.f32.mrf.mxu0 }
 0x257   : > { %v410_v41 = vpack.c.bf16 %v406_v40, %v406_v40 }
 0x259   : > { %v412_v42 = vunpack.c.l.b16 %v410_v41 }
 0x25b   : > { %v413_v43 = vpack.c.b16 %v412_v42, %v412_v42 }
 0x25d   : > { %595 = vrot.lane.b32.xlu0 %v413_v43, %s1261_s10  ;;  %471 = vrot.lane.b32.xlu2 %v413_v43, %s1262_s12  ;;  %s1273_s10 = smov 16   ;;  %s1274_s12 = smov 24  }
 0x25e   : > { %414 = vrot.lane.b32.xlu1 %v413_v43, %s1263_s13  ;;  %v408_v44 = vpop.f32.mrf.mxu0 }
 0x265   : > { %597 = vrot.lane.b32.xlu2 %v413_v43, %s1264_s18 }
 0x266   : > { %473 = vrot.lane.b32.xlu1 %v413_v43, %s1265_s19 }
 0x26d   : > { %533 = vrot.lane.b32.xlu2 %v413_v43, %s1266_s20 }
 0x26e   : > { %535 = vrot.lane.b32.xlu1 %v413_v43, %s1267_s21 }
 0x2b7   : > { %v472_v45 = vpop.permute.xlu2 %471 }
 0x2bf   : > { %v598_v48 = vpop.permute.xlu2 %597 }
 0x2c0   : > { %v603_v51 = vsel %vm416_vm5, %v598_v48, 0 }
 0x2c7   : > { %v534_v54 = vpop.permute.xlu2 %533 }
 0x2cf   : > { %v596_v55 = vpop.permute.xlu0 %595 }
 0x2d0   : > { %v415_v46 = vpop.permute.xlu1 %414 }
 0x2d1   : > { %v421_v47 = vsel %vm416_vm5, %v415_v46, 0 }
 0x2d2   : > { %430 = vmatpush.bf16.xpose.msra.mxu1 %v421_v47 }
 0x2d8   : > { %v474_v49 = vpop.permute.xlu1 %473 }
 0x2d9   : > { %993 = vmatmul.msk.bf16.vlgmr.msra.gmra.mxu1 %vm416_vm5, %v410_v41  ;;  %v479_v50 = vsel %vm416_vm5, %v474_v49, 0 }
 0x2da   : > { %488 = vmatpush.bf16.xpose.msra.mxu3 %v479_v50 }
 0x2e0   : > { %v536_v52 = vpop.permute.xlu1 %535 }
 0x2e1   : > { %995 = vmatmul.msk.bf16.vlgmr.msra.gmra.mxu3 %vm416_vm5, %v472_v45  ;;  %v541_v53 = vsel %vm416_vm5, %v536_v52, 0 }
 0x2e2   : > { %612 = vmatpush.bf16.xpose.msrb.mxu3 %v603_v51  ;;  %550 = vmatpush.bf16.xpose.msrb.mxu0 %v541_v53 }
 0x2e9   : > { %997 = vmatmul.msk.bf16.vlgmr.msrb.gmra.mxu0 %vm416_vm5, %v534_v54 }
 0x2f1   : > { %999 = vmatmul.msk.bf16.vlgmr.msrb.gmra.mxu3 %vm416_vm5, %v596_v55 }
 0x356   : > { %v432_v56 = vpop.f32.mrf.mxu1 }
 0x357   : > { %v436_v57 = vsel %vm416_vm5, %v432_v56, -inf }
 0x358   : > { %437 = vmax.xlane.f32.xlu1 %v436_v57  ;;  %v1044_v57 = vld [vmem:[%s1499_s2 + $0x8] sm:$0xff] }
 0x359   : > { %688 = vmatpush.bf16.msra.mxu0 %v1044_v57 }
 0x35e   : > { %v434_v58 = vpop.f32.mrf.mxu1 }
 0x35f   : > { %v1043_v58 = vld [vmem:[%s1499_s2] sm:$0xff] }
 0x360   : > { %689 = vmatpush.bf16.msra.mxu0 %v1043_v58  ;;  %v1047_v58 = vld [vmem:[%s1503_s6] sm:$0xff] }
 0x364   : > { %v490_v59 = vpop.f32.mrf.mxu3 }
 0x365   : > { %v494_v60 = vsel %vm416_vm5, %v490_v59, -inf }
 0x366   : > { %495 = vmax.xlane.f32.xlu2 %v494_v60  ;;  %v552_v61 = vpop.f32.mrf.mxu0 }
 0x367   : > { %v556_v63 = vsel %vm416_vm5, %v552_v61, -inf }
 0x36c   : > { %v492_v62 = vpop.f32.mrf.mxu3 }
 0x36e   : > { %557 = vmax.xlane.f32.xlu2 %v556_v63  ;;  %v554_v1 = vpop.f32.mrf.mxu0 }
 0x36f   : > { %v1132_v1 = vld [vmem:[%s1500_s3] ss:$0 sm:$0xff] }
 0x374   : > { %v614_v2 = vpop.f32.mrf.mxu3 }
 0x375   : > { %v618_v3 = vsel %vm416_vm5, %v614_v2, -inf }
 0x376   : > { %619 = vmax.xlane.f32.xlu0 %v618_v3 }
 0x37c   : > { %v616_v4 = vpop.f32.mrf.mxu3 }
 0x386   : > { %448 = vrot.lane.b32.xlu2 %v413_v43, %s1268_s22 }
 0x38a   : > { %506 = vrot.lane.b32.xlu0 %v413_v43, %s1269_s23 }
 0x38e   : > { %630 = vrot.lane.b32.xlu2 %v413_v43, %s1270_s24 }
 0x392   : > { %568 = vrot.lane.b32.xlu0 %v413_v43, %s1271_s25 }
 0x3cb   : > { %v438_v5 = vpop.xlane.xlu1 %437 }
 0x3cc   : > { %v439_v6 = vsub.f32 %v432_v56, %v438_v5 }
 0x3ce   : > { %v440_v7 = vmul.f32 1.442695, %v439_v6 }
 0x3d0   : > { %1139 = vpow2.f32 %v440_v7 }
 0x3d6   : > { %v1140_v8 = vpop.eup %1139 }
 0x3d7   : > { %v442_v9 = vsel %vm416_vm5, %v1140_v8, 0.0 }
 0x3d8   : > { %443 = vadd.xlane.f32.xlu1 %v442_v9 }
 0x3d9   : > { %v496_v10 = vpop.xlane.xlu2 %495 }
 0x3da   : > { %v497_v11 = vsub.f32 %v490_v59, %v496_v10 }
 0x3dc   : > { %v498_v12 = vmul.f32 1.442695, %v497_v11 }
 0x3de   : > { %1141 = vpow2.f32 %v498_v12 }
 0x3e1   : > { %v558_v13 = vpop.xlane.xlu2 %557 }
 0x3e2   : > { %v559_v20 = vsub.f32 %v552_v61, %v558_v13 }
 0x3e4   : > { %v1142_v14 = vpop.eup %1141  ;;  %v560_v22 = vmul.f32 1.442695, %v559_v20 }
 0x3e5   : > { %v500_v15 = vsel %vm416_vm5, %v1142_v14, 0.0 }
 0x3e6   : > { %501 = vadd.xlane.f32.xlu1 %v500_v15 }
 0x3e9   : > { %v620_v16 = vpop.xlane.xlu0 %619  ;;  %v449_v17 = vpop.permute.xlu2 %448 }
 0x3ea   : > { %v621_v18 = vsub.f32 %v614_v2, %v620_v16  ;;  %v455_v19 = vsel %vm453_vm6, %v449_v17, 0 }
 0x3eb   : > { %464 = vmatpush.bf16.msra.mxu2 %v455_v19 }
 0x3ec   : > { %v622_v21 = vmul.f32 1.442695, %v621_v18 }
 0x3ee   : > { %1143 = vpow2.f32 %v622_v21 }
 0x3ef   : > { %1145 = vpow2.f32 %v560_v22 }
 0x3f1   : > { %v631_v34 = vpop.permute.xlu2 %630 }
 0x3f2   : > { %v636_v36 = vsel %vm453_vm6, %v631_v34, 0 }
 0x3f4   : > { %v1144_v23 = vpop.eup %1143 }
 0x3f5   : > { %v624_v24 = vsel %vm416_vm5, %v1144_v23, 0.0  ;;  %v1146_v25 = vpop.eup %1145 }
 0x3f6   : > { %625 = vadd.xlane.f32.xlu1 %v624_v24  ;;  %v562_v27 = vsel %vm416_vm5, %v1146_v25, 0.0  ;;  %v1046_v24 = vld [vmem:[#allocation3 + $0x8] sm:$0xff] }
 0x3fc   : > { %v507_v26 = vpop.permute.xlu0 %506 }
 0x3fd   : > { %v512_v28 = vsel %vm453_vm6, %v507_v26, 0 }
 0x3fe   : > { %563 = vadd.xlane.f32.xlu1 %v562_v27  ;;  %521 = vmatpush.bf16.msrb.mxu2 %v512_v28 }
 0x404   : > { %v569_v29 = vpop.permute.xlu0 %568 }
 0x405   : > { %v574_v30 = vsel %vm453_vm6, %v569_v29, 0 }
 0x406   : > { %583 = vmatpush.bf16.msrb.mxu1 %v574_v30 }
 0x40a   : > { %782 = vmatpush.bf16.msra.mxu1 %v1046_v24 }
 0x44b   : > { %v444_v31 = vpop.xlane.xlu1 %443 }
 0x44c   : > { %1147 = vrcp.f32 %v444_v31 }
 0x452   : > { %v1148_v32 = vpop.eup %1147 }
 0x453   : > { %v446_v33 = vmul.f32 %v1148_v32, %v1140_v8 }
 0x455   : > { %v447_v35 = vpack.c.bf16 %v446_v33, %v446_v33 }
 0x457   : > { %994 = vmatmul.msk.bf16.vlgmr.msra.gmra.mxu2 %vm416_vm5, %v447_v35 }
 0x458   : > { %645 = vmatpush.bf16.msra.mxu2 %v636_v36 }
 0x459   : > { %v502_v37 = vpop.xlane.xlu1 %501 }
 0x45a   : > { %1149 = vrcp.f32 %v502_v37  ;;  %v1133_v37 = vld [vmem:[%s1502_s5] ss:$0 sm:$0xff] }
 0x460   : > { %v1150_v38 = vpop.eup %1149 }
 0x461   : > { %v504_v39 = vmul.f32 %v1150_v38, %v1142_v14 }
 0x463   : > { %v505_v40 = vpack.c.bf16 %v504_v39, %v504_v39 }
 0x467   : > { %996 = vmatmul.msk.bf16.vlgmr.msrb.gmra.mxu2 %vm416_vm5, %v505_v40 }
 0x469   : > { %v626_v41 = vpop.xlane.xlu1 %625 }
 0x46a   : > { %1151 = vrcp.f32 %v626_v41 }
 0x470   : > { %v1152_v42 = vpop.eup %1151 }
 0x471   : > { %v628_v43 = vmul.f32 %v1152_v42, %v1144_v23  ;;  %v564_v44 = vpop.xlane.xlu1 %563 }
 0x472   : > { %1153 = vrcp.f32 %v564_v44  ;;  %v1050_v44 = vld [vmem:[%s1503_s6 + $0x18] sm:$0xff] }
 0x473   : > { %v629_v45 = vpack.c.bf16 %v628_v43, %v628_v43  ;;  %878 = vmatpush.bf16.msra.mxu3 %v1050_v44 }
 0x477   : > { %1000 = vmatmul.msk.bf16.vlgmr.msra.gmra.mxu2 %vm416_vm5, %v629_v45 }
 0x478   : > { %v1154_v46 = vpop.eup %1153 }
 0x479   : > { %v566_v47 = vmul.f32 %v1154_v46, %v1146_v25  ;;  %v1045_v25 = vld [vmem:[#allocation3] sm:$0xff] }
 0x47a   : > { %783 = vmatpush.bf16.msra.mxu1 %v1045_v25 }
 0x47b   : > { %v567_v48 = vpack.c.bf16 %v566_v47, %v566_v47 }
 0x47d   : > { %998 = vmatmul.msk.bf16.vlgmr.msrb.gmra.mxu1 %vm416_vm5, %v567_v48 }
 0x4da   : > { %v466_v49 = vpop.f32.mrf.mxu2 }
 0x4db   : > { %470 = vst.msk [vmem:[#allocation2] sm:$0xff] %vm416_vm5, %v466_v49  ;;  %v1049_v49 = vld [vmem:[%s1503_s6 + $0x10] sm:$0xff] }
 0x4dc   : > { %879 = vmatpush.bf16.msra.mxu3 %v1049_v49 }
 0x4e2   : > { %v468_v50 = vpop.f32.mrf.mxu2 }
 0x4ea   : > { %v523_v51 = vpop.f32.mrf.mxu2 }
 0x4eb   : > { %528 = vrot.lane.b32.xlu1 %v523_v51, %s1272_s26 }
 0x4f2   : > { %v525_v52 = vpop.f32.mrf.mxu2 }
 0x4fa   : > { %v585_v53 = vpop.f32.mrf.mxu1  ;;  %v647_v54 = vpop.f32.mrf.mxu2 }
 0x4fb   : > { %590 = vrot.lane.b32.xlu2 %v585_v53, %s1273_s10  ;;  %652 = vrot.lane.b32.xlu0 %v647_v54, %s1274_s12  ;;  %v1048_v54 = vld [vmem:[%s1503_s6 + $0x8] sm:$0xff] }
 0x4fc   : > { %880 = vmatpush.bf16.msra.mxu3 %v1048_v54 }
 0x500   : > { %881 = vmatpush.bf16.msra.mxu3 %v1047_v58 }
 0x502   : > { %v587_v55 = vpop.f32.mrf.mxu1  ;;  %v649_v56 = vpop.f32.mrf.mxu2 }
 0x555   : > { %v591_v60 = vpop.permute.xlu2 %590 }
 0x55d   : > { %v529_v59 = vpop.permute.xlu1 %528 }
 0x55e   : > { %532 = vst.msk [vmem:[#allocation2] sm:$0xff] %vm531_vm7, %v529_v59 }
 0x55f   : > { %594 = vst.msk [vmem:[#allocation2] sm:$0xff] %vm593_vm8, %v591_v60 }
 0x56d   : > { %v653_v61 = vpop.permute.xlu0 %652 }
 0x56e   : > { %656 = vst.msk [vmem:[#allocation2] sm:$0xff] %vm655_vm9, %v653_v61 }
 0x575   : > { %v657_v62 = vld [vmem:[#allocation2] sm:$0xff] }
 0x576   : > { %v658_v63 = vpack.c.bf16 %v657_v62, %v657_v62 }
 0x578   : > { %1009 = vmatmul.msk.bf16.vlgmr.msra.gmra.mxu0 %vm320_vm0, %v658_v63 }
 0x5f5   : > { %v691_v2 = vpop.f32.mrf.mxu0 }
 0x5f6   : > { %v692_v3 = vadd.f32 %v1132_v1, %v691_v2 }
 0x5f8   : > { %v1436_v4 = vadd.f32 %v692_v3, %v1383_v0 }
 0x5fa   : > { %v696_v5 = vsel %vm320_vm0, %v1436_v4, 0.0 }
 0x5fb   : > { %697 = vadd.xlane.f32.xlu2 %v696_v5 }
 0x5fd   : > { %v693_v6 = vpop.f32.mrf.mxu0 }
 0x66e   : > { %v698_v7 = vpop.xlane.xlu2 %697 }
 0x66f   : > { %v699_v8 = vrot.slane %v698_v7, 4 }
 0x671   : > { %v700_v9 = vadd.f32 %v699_v8, %v698_v7 }
 0x673   : > { %v701_v10 = vrot.slane %v700_v9, 2 }
 0x675   : > { %v702_v11 = vadd.f32 %v701_v10, %v700_v9 }
 0x677   : > { %v703_v12 = vrot.slane %v702_v11, 1 }
 0x679   : > { %v704_v13 = vadd.f32 %v703_v12, %v702_v11 }
 0x67b   : > { %1059 = vpush %v704_v13 }
 0x6ac   : > { %s1060_s23 = spop %1059 }
 0x6ad   : > { %s714_s24 = smul.f32 %s1060_s23, %s1387_s17 }
 0x6af   : > { %v715_v14 = vstv %s714_s24 }
 0x6b0   : > { %v716_v15 = vsub.f32 %v1436_v4, %v715_v14 }
 0x6b2   : > { %v717_v0 = vmul.f32 %v716_v15, %v716_v15 }
 0x6b4   : > { %v718_v16 = vsel %vm320_vm0, %v717_v0, 0.0 }
 0x6b5   : > { %719 = vadd.xlane.f32.xlu0 %v718_v16 }
 0x728   : > { %v720_v17 = vpop.xlane.xlu0 %719 }
 0x729   : > { %v721_v18 = vrot.slane %v720_v17, 4 }
 0x72b   : > { %v722_v19 = vadd.f32 %v721_v18, %v720_v17 }
 0x72d   : > { %v723_v20 = vrot.slane %v722_v19, 2 }
 0x72f   : > { %v724_v21 = vadd.f32 %v723_v20, %v722_v19 }
 0x731   : > { %v725_v22 = vrot.slane %v724_v21, 1 }
 0x733   : > { %v726_v23 = vadd.f32 %v725_v22, %v724_v21  ;;  %v1134_v22 = vld [vmem:[%s1504_s7] ss:$0 sm:$0xff] }
 0x735   : > { %1061 = vpush %v726_v23 }
 0x766   : > { %s1062_s25 = spop %1061 }
 0x767   : > { %s736_s26 = smul.f32 %s1062_s25, %s1387_s17 }
 0x769   : > { %s737_s10 = sadd.f32 1e-05, %s736_s26  ;;  %s311_s26 = sand.u32 1, %s1247_s28  }
 0x76b   : > { %v738_v26 = vstv %s737_s10  ;;  %s982_s10 = sshll.u32 %s311_s26, 3 }
 0x76c   : > { %1155 = vrsqrt.f32 %v738_v26  ;;  %vm745_vm11 = vweird.f32 %v738_v26  ;;  %s313_s21 = scalar_lea.vmem [#allocation6], %s982_s10  ;;  %s1209_s10 = scalar_lea.hbm %s1505_s8, 16 }
 0x76d   : > { %s902_s22 = sshll.u32 %s313_s21, 4  ;;  %s903_s22 = int_to_ptr.vmem [resolvable:$true] %s902_s22 }
 0x772   : > { %v1156_v27 = vpop.eup %1155 }
 0x773   : > { %v740_v28 = vmul.f32 %v1156_v27, %v738_v26  ;;  %vm746_vm10 = vweird.f32 %v1156_v27 }
 0x774   : > { %vm747_vm12 = vmor %vm745_vm11, %vm746_vm10 }
 0x775   : > { %v741_v29 = vmul.f32 %v1156_v27, %v740_v28 }
 0x777   : > { %v742_v30 = vmul.f32 0.5, %v741_v29 }
 0x779   : > { %v743_v31 = vsub.f32 1.5, %v742_v30 }
 0x77b   : > { %v744_v32 = vmul.f32 %v1156_v27, %v743_v31 }
 0x77d   : > { %v748_v33 = vsel %vm747_vm12, %v1156_v27, %v744_v32 }
 0x77e   : > { %1063 = vpush %v748_v33 }
 0x7af   : > { %s1064_s12 = spop %1063 }
 0x7b0   : > { %v750_v34 = vstv %s1064_s12  ;;  %s1038_s12 = sshll.u32 %s1341_s9, 3  ;;  %s890_s9 = scalar_lea.sflag [#allocation5], %s311_s26 }
 0x7b1   : > { %v751_v35 = vmul.f32 %v750_v34, %v716_v15  ;;  %s900_s20 = scalar_lea.hbm %s1505_s8, %s1038_s12 }
 0x7b2   : > { %s904_s23 = sshll.u32 %s900_s20, 4  ;;  %s905_s23 = int_to_ptr.hbm [resolvable:$true] %s904_s23 }
 0x7b3   : > { %v752_v36 = vpack.c.bf16 %v751_v35, %v751_v35  ;;  %s1203_s24 = sshra.s32 %s905_s23, 4  ;;  %s1204_s24 = int_to_ptr.hbm [resolvable:$true] %s1203_s24 }
 0x7b4   : > { %s1205_s25 = scalar_lea.hbm %s1204_s24, 8  ;;  %p1210_p3 = scmp.lt.s32.totalorder %s1204_s24, %s1505_s8 }
 0x7b5   : > { %1018 = vmatmul.msk.bf16.vlgmr.msra.gmra.mxu1 %vm320_vm0, %v752_v36  ;;  %p1206_p0 = scmp.ne.s32.totalorder %s1204_s24, %s1205_s25  ;;  %p1211_p4 = scmp.lt.s32.totalorder %s1209_s10, %s1205_s25 }
 0x7b7   : > { %p1207_p1 = pnand %p1206_p0, %p1358_p5  ;;  %p1212_p7 = por %p1211_p4, %p1210_p3 }
 0x7b9   : > { %p1208_p2 = pneg %p1207_p1 }
 0x7bb   : > { %p1213_p8 = pnand %p1212_p7, %p1208_p2 }
 0x832   : > { %v785_v38 = vpop.f32.mrf.mxu1 }
 0x833   : > { %v786_v39 = vadd.f32 %v1133_v37, %v785_v38 }
 0x835   : > { %v790_v40 = vmul.f32 0.70710677, %v786_v39  ;;  %v789_v18 = vmul.f32 0.5, %v786_v39 }
 0x837   : > { %v791_v41 = vmul.f32 %v790_v40, %v790_v40 }
 0x839   : > { %v792_v42 = vmin.f32 %v791_v41, 16.0 }
 0x83a   : > { %v787_v43 = vpop.f32.mrf.mxu1 }
 0x83b   : > { %v793_v45 = vmul.f32 2.1237322e-06, %v792_v42  ;;  %v804_v46 = vmul.f32 3.8918573e-05, %v792_v42 }
 0x83d   : > { %v794_v47 = vadd.f32 0.00028619796, %v793_v45  ;;  %v805_v48 = vadd.f32 0.001143296, %v804_v46 }
 0x83f   : > { %v795_v50 = vmul.f32 %v794_v47, %v792_v42  ;;  %v806_v51 = vmul.f32 %v805_v48, %v792_v42 }
 0x841   : > { %v807_v52 = vadd.f32 0.014752088, %v806_v51  ;;  %v796_v53 = vadd.f32 0.0036580483, %v795_v50 }
 0x843   : > { %v808_v55 = vmul.f32 %v807_v52, %v792_v42  ;;  %v797_v57 = vmul.f32 %v796_v53, %v792_v42 }
 0x845   : > { %v809_v56 = vadd.f32 0.112945676, %v808_v55  ;;  %v798_v61 = vadd.f32 0.05243302, %v797_v57 }
 0x847   : > { %v810_v59 = vmul.f32 %v809_v56, %v792_v42  ;;  %v799_v1 = vmul.f32 %v798_v61, %v792_v42 }
 0x849   : > { %v811_v60 = vadd.f32 0.4994258, %v810_v59  ;;  %v800_v2 = vadd.f32 0.18741608, %v799_v1 }
 0x84b   : > { %v812_v62 = vmul.f32 %v811_v60, %v792_v42  ;;  %v801_v5 = vmul.f32 %v800_v2, %v792_v42 }
 0x84d   : > { %v813_v63 = vadd.f32 1.0, %v812_v62  ;;  %v802_v9 = vadd.f32 1.1283791, %v801_v5 }
 0x84f   : > { %1157 = vrcp.f32 %v813_v63  ;;  %v825_v8 = vand.u32 2147483648, %v813_v63  ;;  %v823_v11 = vand.u32 2147483647, %v813_v63  ;;  %vm819_vm14 = vweird.f32 %v813_v63 }
 0x850   : > { %v803_v14 = vmul.f32 %v802_v9, %v790_v40 }
 0x851   : > { %v826_v13 = vor.u32 1.1754944e-38, %v825_v8  ;;  %vm824_vm1 = vcmp.eq.f32.partialorder %v823_v11, 8.507059e+37 }
 0x855   : > { %v1158_v3 = vpop.eup %1157 }
 0x856   : > { %v815_v6 = vmul.f32 %v1158_v3, %v813_v63  ;;  %vm820_vm13 = vweird.f32 %v1158_v3 }
 0x857   : > { %vm821_vm15 = vmor %vm819_vm14, %vm820_vm13 }
 0x858   : > { %v816_v7 = vsub.f32 1.0, %v815_v6 }
 0x85a   : > { %v817_v10 = vmul.f32 %v1158_v3, %v816_v7 }
 0x85c   : > { %v818_v12 = vadd.f32 %v1158_v3, %v817_v10 }
 0x85e   : > { %v822_v15 = vsel %vm821_vm15, %v1158_v3, %v818_v12 }
 0x85f   : > { %v827_v0 = vsel %vm824_vm1, %v826_v13, %v822_v15 }
 0x860   : > { %v828_v16 = vmul.f32 %v827_v0, %v803_v14 }
 0x862   : > { %v1019_v17 = vclamps-f32 %v828_v16, 1.0 }
 0x864   : > { %v831_v19 = vadd.f32 1.0, %v1019_v17 }
 0x866   : > { %v832_v20 = vmul.f32 %v831_v19, %v789_v18 }
 0x868   : > { %v833_v21 = vpack.c.bf16 %v832_v20, %v832_v20 }
 0x86a   : > { %1036 = vmatmul.msk.bf16.vlgmr.msra.gmra.mxu3 %vm870_vm2, %v833_v21 }
 0x8ed   : > { %v883_v23 = vpop.f32.mrf.mxu3 }
 0x8ee   : > { %v884_v24 = vadd.f32 %v1134_v22, %v883_v23 }
 0x8f0   : > { %v887_v25 = vadd.f32 %v884_v24, %v1436_v4 }
 0x8f2   : > { %888 = vst.msk [vmem:[%s313_s21] sm:$0xff] %vm320_vm0, %v887_v25 }
 0x8f3   : > { %1216 = shalt.err (!%p1213_p8)
}
 0x8f4   : > { %1069 = dma.vmem_to_hbm [thread:$0]  (%p1358_p5), %s903_s22, 128, %s905_s23, %s890_s9  }
 0x8f5   : > { %v885_v4 = vpop.f32.mrf.mxu3 }
 0x8f6 PF: > { %p1081_p9 = scmp.ge.s32.totalorder %s1255_s30, 2  ;;  %s916_s26 = sand.u32 1, %s1243_s27  }
 0x8f7   : > { %s917_s19 = scalar_lea.sflag [#allocation5], %s916_s26 }
 0x8f8   : > { %p1076_p10 = pnand %p1081_p9, %p1362_p6 }
 0x8fa   : > { %p1077_p11 = pneg %p1076_p10 }
 0x8fc   : > { %1238 = dma.done.wait (%p1077_p11), %s917_s19, 128  }
 0x8fd   : > { %1240 = vsyncadd (%p1077_p11), %s917_s19, 4294967168  ;;  %p19_p12 = scmp.ge.s32.totalorder %s1345_s11, 4   ;;  %s1508_s27 = smov %s1247_s28 }
 0x8fe   : > { %s1509_s28 = smov %s1251_s29  ;;  %s1510_s29 = smov %s1356_s14 }
 0x8ff   : > { %s1511_s30 = smov %s1345_s11  ;;  %21 = sbr.rel (!%p19_p12) target bundleno = 4 (0x4), region = 92 }
 0x904   :  { %923 = vsyncpa [#allocation4], 1 }
 0x905   :  { %925 = vsyncpa [#allocation4 + $0x1], 1 }
 0x906   :  { %926 = vsyncpa [#allocation5], 1 }
 0x907   :  { %928 = vsyncpa [#allocation5 + $0x1], 1 }

// kernel: _transformer_block_impl.1
= control target key start
LH: loop header
LB: loop body
LE: loop exit
PB: predicated region body
PF: predicated region fallthrough
CT: control target
= control target key end

     0   :  { %13 = vsyncpa [#allocation4], 0  ;;  %s1497_s0 = inlined_call_operand.vmem [shape: f32[2,8,32], index: 0, kind: input, shape index: {}]   ;;  %s1498_s1 = inlined_call_operand.vmem [shape: bf16[32,96], index: 1, kind: input, shape index: {}]   ;;  %s1499_s2 = inlined_call_operand.vmem [shape: bf16[32,32], index: 2, kind: input, shape index: {}]   ;;  %s1500_s3 = inlined_call_operand.vmem [shape: f32[1,32], index: 3, kind: input, shape index: {}]   ;;  %s1501_s4 = inlined_call_operand.hbm [shape: bf16[32,64], index: 4, kind: input, shape index: {}]   ;;  %s1502_s5 = inlined_call_operand.vmem [shape: f32[1,64], index: 5, kind: input, shape index: {}]   ;;  %s1503_s6 = inlined_call_operand.vmem [shape: bf16[64,32], index: 6, kind: input, shape index: {}]   ;;  %s1504_s7 = inlined_call_operand.vmem [shape: f32[1,32], index: 7, kind: input, shape index: {}]   ;;  %s1505_s8 = inlined_call_operand.hbm [shape: f32[2,8,32], index: 8, kind: output, shape index: {}]  }
   0x1   :  { %14 = vsyncpa [#allocation5], 0 }
   0x2   :  { %16 = vsyncpa [#allocation5 + $0x1], 0  ;;  %s1320_s27 = smov 0   ;;  %s1322_s28 = smov 0  }
   0x3   :  { %s1324_s29 = smov 0   ;;  %s1326_s30 = smov 0  }
   0x4 LB: > { %s1341_s9 = sadd.s32 4294967295, %s1255_s30   ;;  %s976_s10 = sadd.s32 4294967294, %s1255_s30   ;;  %s1255_s30 = sphi %s1326_s30, %s1511_s30   ;;  %s1251_s29 = sphi %s1324_s29, %s1510_s29   ;;  %s1247_s28 = sphi %s1322_s28, %s1509_s28   ;;  %s1243_s27 = sphi %s1320_s27, %s1508_s27  }
   0x5   : > { %s1345_s11 = sadd.s32 1, %s1255_s30   ;;  %s202_s12 = sadd.s32 1, %s1251_s29 }
   0x6   : > { %s199_s13 = ssub.s32 %s1255_s30, %s1345_s11  ;;  %p212_p0 = scmp.ne.s32.totalorder %s1251_s29, %s1247_s28 }
   0x7   : > { %p200_p1 = scmp.eq.s32.totalorder %s199_s13, 0  ;;  %p213_p2 = scmp.eq.s32.totalorder %s1341_s9, 1 }
   0x8   : > { %p218_p3 = scmp.ne.s32.totalorder %s1247_s28, %s1243_s27  ;;  %p219_p4 = scmp.eq.s32.totalorder %s976_s10, 1 }
   0x9   : > { %s1356_s14 = scalar_select %p200_p1, %s1251_s29, %s202_s12  }
   0xa   : > { %p1358_p5 = por %p213_p2, %p212_p0  ;;  %p1362_p6 = por %p219_p4, %p218_p3 }
   0xb   : > { %p977_p7 = scmp.ge.s32.totalorder %s1255_s30, 1  ;;  %p226_p8 = scmp.lt.s32.totalorder %s1255_s30, 3 }
   0xc   : > { %p1079_p9 = scmp.eq.s32.totalorder %s1341_s9, 0  ;;  %s246_s19 = sshll.u32 %s1501_s4, 4  ;;  %s247_s19 = int_to_ptr.hbm [resolvable:$true] %s246_s19 }
   0xd   : > { %p227_p10 = pnand %p977_p7, %p226_p8  ;;  %s1257_s20 = smov [#allocation3]  }
   0xe   : > { %s248_s21 = sshll.u32 %s1257_s20, 4  ;;  %s1258_s22 = smov 64   ;;  %s249_s21 = int_to_ptr.vmem [resolvable:$true] %s248_s21 }
   0xf   : > { %p1071_p11 = pneg %p227_p10  ;;  %s1259_s23 = smov 4  }
  0x10   : > { %280 = sbr.rel (%p227_p10) target bundleno = 2294 (0x8f6), region = 52 }
  0x11   : > { %p1072_p12 = pnand %p1079_p9, %p1071_p11 }
  0x13   : > { %1074 = dma.hbm_to_vmem [thread:$0]  (!%p1072_p12), %s247_s19, 256, %s249_s21, [#allocation4], %s1258_s22, %s1258_s22, %s1259_s23  }
  0x15   : > { %1234 = dma.done.wait (%p1079_p9), [#allocation4], 256  }
  0x16   : > { %1236 = vsyncadd (%p1079_p9), [#allocation4], 4294967040  ;;  %p314_p13 = scmp.lt.s32.totalorder %s1341_s9, 1  ;;  %vm320_vm0 = vcmask 261120   ;;  %v1260_v2 = vmov 256.0   ;;  %v1042_v27 = vld [vmem:[%s1498_s1 + $0x8] sm:$0xff] }
  0x17   : > { %1135 = vrcp.f32 %v1260_v2  ;;  %403 = vmatpush.bf16.msra.mxu0 %v1042_v27  ;;  %v1041_v36 = vld [vmem:[%s1498_s1] sm:$0xff]  ;;  %s1261_s10 = smov 104   ;;  %s1265_s19 = smov 88   ;;  %vm416_vm5 = vcmask 64512   ;;  %vm453_vm6 = vcmask 1043456   ;;  %vm531_vm7 = vcmask 130112  }
  0x18   : > { %s315_s24 = scalar_select %p314_p13, %s1341_s9, 1  ;;  %vm593_vm8 = vcmask 195712   ;;  %vm655_vm9 = vcmask 261312  }
  0x19   : > { %s1266_s20 = smov 112  }
  0x1a   : > { %s983_s25 = sshll.u32 %s315_s24, 3  ;;  %s1270_s24 = smov 40  }
  0x1b   : > { %s317_s12 = scalar_lea.vmem %s1497_s0, %s983_s25  ;;  %404 = vmatpush.bf16.msra.mxu0 %v1041_v36  ;;  %s1271_s25 = smov 48  }
  0x1c   : > { %v1383_v0 = vld [vmem:[%s317_s12] sm:$0xff]  ;;  %s1262_s12 = smov 120  }
  0x1d   : > { %v321_v1 = vsel %vm320_vm0, %v1383_v0, 0.0  ;;  %v1136_v3 = vpop.eup %1135 }
  0x1e   : > { %322 = vadd.xlane.f32.xlu0 %v321_v1  ;;  %v332_v4 = vmul.f32 256.0, %v1136_v3  ;;  %vm336_vm1 = vweird.f32 %v1136_v3 }
  0x20   : > { %v333_v5 = vsub.f32 1.0, %v332_v4 }
  0x22   : > { %v334_v9 = vmul.f32 %v1136_v3, %v333_v5 }
  0x24   : > { %v335_v12 = vadd.f32 %v1136_v3, %v334_v9 }
  0x26   : > { %v337_v15 = vsel %vm336_vm1, %v1136_v3, %v335_v12 }
  0x91   : > { %v323_v6 = vpop.xlane.xlu0 %322 }
  0x92   : > { %v324_v7 = vrot.slane %v323_v6, 4 }
  0x94   : > { %v325_v8 = vadd.f32 %v324_v7, %v323_v6 }
  0x96   : > { %v326_v10 = vrot.slane %v325_v8, 2 }
  0x98   : > { %v327_v11 = vadd.f32 %v326_v10, %v325_v8 }
  0x9a   : > { %v328_v13 = vrot.slane %v327_v11, 1 }
  0x9c   : > { %v329_v14 = vadd.f32 %v328_v13, %v327_v11 }
  0x9e   : > { %1051 = vpush %v329_v14 }
  0x9f   : > { %1053 = vpush %v337_v15 }
  0xcf   : > { %s1052_s13 = spop %1051 }
  0xd0   : > { %s1387_s17 = spop %1053 }
  0xd1   : > { %s339_s18 = smul.f32 %s1387_s17, %s1052_s13  ;;  %s1263_s13 = smov 96  }
  0xd3   : > { %v340_v16 = vstv %s339_s18  ;;  %s1264_s18 = smov 72  }
  0xd4   : > { %v341_v17 = vsub.f32 %v1383_v0, %v340_v16 }
  0xd6   : > { %v342_v18 = vmul.f32 %v341_v17, %v341_v17 }
  0xd8   : > { %v343_v19 = vsel %vm320_vm0, %v342_v18, 0.0 }
  0xd9   : > { %344 = vadd.xlane.f32.xlu0 %v343_v19 }
 0x14c   : > { %v345_v20 = vpop.xlane.xlu0 %344 }
 0x14d   : > { %v346_v21 = vrot.slane %v345_v20, 4 }
 0x14f   : > { %v347_v22 = vadd.f32 %v346_v21, %v345_v20 }
 0x151   : > { %v348_v23 = vrot.slane %v347_v22, 2 }
 0x153   : > { %v349_v24 = vadd.f32 %v348_v23, %v347_v22 }
 0x155   : > { %v350_v25 = vrot.slane %v349_v24, 1 }
 0x157   : > { %v351_v26 = vadd.f32 %v350_v25, %v349_v24 }
 0x159   : > { %1055 = vpush %v351_v26 }
 0x18a   : > { %s1056_s21 = spop %1055 }
 0x18b   : > { %s361_s22 = smul.f32 %s1056_s21, %s1387_s17  ;;  %s1267_s21 = smov 80  }
 0x18d   : > { %s362_s23 = sadd.f32 1e-05, %s361_s22  ;;  %s1268_s22 = smov 64  }
 0x18f   : > { %v363_v28 = vstv %s362_s23  ;;  %s1269_s23 = smov 56  }
 0x190   : > { %1137 = vrsqrt.f32 %v363_v28  ;;  %vm370_vm3 = vweird.f32 %v363_v28 }
 0x196   : > { %v1138_v29 = vpop.eup %1137 }
 0x197   : > { %v365_v30 = vmul.f32 %v1138_v29, %v363_v28  ;;  %vm371_vm2 = vweird.f32 %v1138_v29 }
 0x198   : > { %vm372_vm4 = vmor %vm370_vm3, %vm371_vm2  ;;  %vm870_vm2 = vcmask 523264  }
 0x199   : > { %v366_v31 = vmul.f32 %v1138_v29, %v365_v30 }
 0x19b   : > { %v367_v32 = vmul.f32 0.5, %v366_v31 }
 0x19d   : > { %v368_v33 = vsub.f32 1.5, %v367_v32 }
 0x19f   : > { %v369_v34 = vmul.f32 %v1138_v29, %v368_v33 }
 0x1a1   : > { %v373_v35 = vsel %vm372_vm4, %v1138_v29, %v369_v34 }
 0x1a2   : > { %1057 = vpush %v373_v35 }
 0x1d3   : > { %s1058_s26 = spop %1057 }
 0x1d4   : > { %v375_v37 = vstv %s1058_s26  ;;  %s1272_s26 = smov 8  }
 0x1d5   : > { %v376_v38 = vmul.f32 %v375_v37, %v341_v17 }
 0x1d7   : > { %v377_v39 = vpack.c.bf16 %v376_v38, %v376_v38 }
 0x1d9   : > { %992 = vmatmul.msk.bf16.vlgmr.msra.gmra.mxu0 %vm320_vm0, %v377_v39 }
 0x256   : > { %v406_v40 = vpop.f32.mrf.mxu0 }
 0x257   : > { %v410_v41 = vpack.c.bf16 %v406_v40, %v406_v40 }
 0x259   : > { %v412_v42 = vunpack.c.l.b16 %v410_v41 }
 0x25b   : > { %v413_v43 = vpack.c.b16 %v412_v42, %v412_v42 }
 0x25d   : > { %595 = vrot.lane.b32.xlu0 %v413_v43, %s1261_s10  ;;  %471 = vrot.lane.b32.xlu2 %v413_v43, %s1262_s12  ;;  %s1273_s10 = smov 16   ;;  %s1274_s12 = smov 24  }
 0x25e   : > { %414 = vrot.lane.b32.xlu1 %v413_v43, %s1263_s13  ;;  %v408_v44 = vpop.f32.mrf.mxu0 }
 0x265   : > { %597 = vrot.lane.b32.xlu2 %v413_v43, %s1264_s18 }
 0x266   : > { %473 = vrot.lane.b32.xlu1 %v413_v43, %s1265_s19 }
 0x26d   : > { %533 = vrot.lane.b32.xlu2 %v413_v43, %s1266_s20 }
 0x26e   : > { %535 = vrot.lane.b32.xlu1 %v413_v43, %s1267_s21 }
 0x2b7   : > { %v472_v45 = vpop.permute.xlu2 %471 }
 0x2bf   : > { %v598_v48 = vpop.permute.xlu2 %597 }
 0x2c0   : > { %v603_v51 = vsel %vm416_vm5, %v598_v48, 0 }
 0x2c7   : > { %v534_v54 = vpop.permute.xlu2 %533 }
 0x2cf   : > { %v596_v55 = vpop.permute.xlu0 %595 }
 0x2d0   : > { %v415_v46 = vpop.permute.xlu1 %414 }
 0x2d1   : > { %v421_v47 = vsel %vm416_vm5, %v415_v46, 0 }
 0x2d2   : > { %430 = vmatpush.bf16.xpose.msra.mxu1 %v421_v47 }
 0x2d8   : > { %v474_v49 = vpop.permute.xlu1 %473 }
 0x2d9   : > { %993 = vmatmul.msk.bf16.vlgmr.msra.gmra.mxu1 %vm416_vm5, %v410_v41  ;;  %v479_v50 = vsel %vm416_vm5, %v474_v49, 0 }
 0x2da   : > { %488 = vmatpush.bf16.xpose.msra.mxu3 %v479_v50 }
 0x2e0   : > { %v536_v52 = vpop.permute.xlu1 %535 }
 0x2e1   : > { %995 = vmatmul.msk.bf16.vlgmr.msra.gmra.mxu3 %vm416_vm5, %v472_v45  ;;  %v541_v53 = vsel %vm416_vm5, %v536_v52, 0 }
 0x2e2   : > { %612 = vmatpush.bf16.xpose.msrb.mxu3 %v603_v51  ;;  %550 = vmatpush.bf16.xpose.msrb.mxu0 %v541_v53 }
 0x2e9   : > { %997 = vmatmul.msk.bf16.vlgmr.msrb.gmra.mxu0 %vm416_vm5, %v534_v54 }
 0x2f1   : > { %999 = vmatmul.msk.bf16.vlgmr.msrb.gmra.mxu3 %vm416_vm5, %v596_v55 }
 0x356   : > { %v432_v56 = vpop.f32.mrf.mxu1 }
 0x357   : > { %v436_v57 = vsel %vm416_vm5, %v432_v56, -inf }
 0x358   : > { %437 = vmax.xlane.f32.xlu1 %v436_v57  ;;  %v1044_v57 = vld [vmem:[%s1499_s2 + $0x8] sm:$0xff] }
 0x359   : > { %688 = vmatpush.bf16.msra.mxu0 %v1044_v57 }
 0x35e   : > { %v434_v58 = vpop.f32.mrf.mxu1 }
 0x35f   : > { %v1043_v58 = vld [vmem:[%s1499_s2] sm:$0xff] }
 0x360   : > { %689 = vmatpush.bf16.msra.mxu0 %v1043_v58  ;;  %v1047_v58 = vld [vmem:[%s1503_s6] sm:$0xff] }
 0x364   : > { %v490_v59 = vpop.f32.mrf.mxu3 }
 0x365   : > { %v494_v60 = vsel %vm416_vm5, %v490_v59, -inf }
 0x366   : > { %495 = vmax.xlane.f32.xlu2 %v494_v60  ;;  %v552_v61 = vpop.f32.mrf.mxu0 }
 0x367   : > { %v556_v63 = vsel %vm416_vm5, %v552_v61, -inf }
 0x36c   : > { %v492_v62 = vpop.f32.mrf.mxu3 }
 0x36e   : > { %557 = vmax.xlane.f32.xlu2 %v556_v63  ;;  %v554_v1 = vpop.f32.mrf.mxu0 }
 0x36f   : > { %v1132_v1 = vld [vmem:[%s1500_s3] ss:$0 sm:$0xff] }
 0x374   : > { %v614_v2 = vpop.f32.mrf.mxu3 }
 0x375   : > { %v618_v3 = vsel %vm416_vm5, %v614_v2, -inf }
 0x376   : > { %619 = vmax.xlane.f32.xlu0 %v618_v3 }
 0x37c   : > { %v616_v4 = vpop.f32.mrf.mxu3 }
 0x386   : > { %448 = vrot.lane.b32.xlu2 %v413_v43, %s1268_s22 }
 0x38a   : > { %506 = vrot.lane.b32.xlu0 %v413_v43, %s1269_s23 }
 0x38e   : > { %630 = vrot.lane.b32.xlu2 %v413_v43, %s1270_s24 }
 0x392   : > { %568 = vrot.lane.b32.xlu0 %v413_v43, %s1271_s25 }
 0x3cb   : > { %v438_v5 = vpop.xlane.xlu1 %437 }
 0x3cc   : > { %v439_v6 = vsub.f32 %v432_v56, %v438_v5 }
 0x3ce   : > { %v440_v7 = vmul.f32 1.442695, %v439_v6 }
 0x3d0   : > { %1139 = vpow2.f32 %v440_v7 }
 0x3d6   : > { %v1140_v8 = vpop.eup %1139 }
 0x3d7   : > { %v442_v9 = vsel %vm416_vm5, %v1140_v8, 0.0 }
 0x3d8   : > { %443 = vadd.xlane.f32.xlu1 %v442_v9 }
 0x3d9   : > { %v496_v10 = vpop.xlane.xlu2 %495 }
 0x3da   : > { %v497_v11 = vsub.f32 %v490_v59, %v496_v10 }
 0x3dc   : > { %v498_v12 = vmul.f32 1.442695, %v497_v11 }
 0x3de   : > { %1141 = vpow2.f32 %v498_v12 }
 0x3e1   : > { %v558_v13 = vpop.xlane.xlu2 %557 }
 0x3e2   : > { %v559_v20 = vsub.f32 %v552_v61, %v558_v13 }
 0x3e4   : > { %v1142_v14 = vpop.eup %1141  ;;  %v560_v22 = vmul.f32 1.442695, %v559_v20 }
 0x3e5   : > { %v500_v15 = vsel %vm416_vm5, %v1142_v14, 0.0 }
 0x3e6   : > { %501 = vadd.xlane.f32.xlu1 %v500_v15 }
 0x3e9   : > { %v620_v16 = vpop.xlane.xlu0 %619  ;;  %v449_v17 = vpop.permute.xlu2 %448 }
 0x3ea   : > { %v621_v18 = vsub.f32 %v614_v2, %v620_v16  ;;  %v455_v19 = vsel %vm453_vm6, %v449_v17, 0 }
 0x3eb   : > { %464 = vmatpush.bf16.msra.mxu2 %v455_v19 }
 0x3ec   : > { %v622_v21 = vmul.f32 1.442695, %v621_v18 }
 0x3ee   : > { %1143 = vpow2.f32 %v622_v21 }
 0x3ef   : > { %1145 = vpow2.f32 %v560_v22 }
 0x3f1   : > { %v631_v34 = vpop.permute.xlu2 %630 }
 0x3f2   : > { %v636_v36 = vsel %vm453_vm6, %v631_v34, 0 }
 0x3f4   : > { %v1144_v23 = vpop.eup %1143 }
 0x3f5   : > { %v624_v24 = vsel %vm416_vm5, %v1144_v23, 0.0  ;;  %v1146_v25 = vpop.eup %1145 }
 0x3f6   : > { %625 = vadd.xlane.f32.xlu1 %v624_v24  ;;  %v562_v27 = vsel %vm416_vm5, %v1146_v25, 0.0  ;;  %v1046_v24 = vld [vmem:[#allocation3 + $0x8] sm:$0xff] }
 0x3fc   : > { %v507_v26 = vpop.permute.xlu0 %506 }
 0x3fd   : > { %v512_v28 = vsel %vm453_vm6, %v507_v26, 0 }
 0x3fe   : > { %563 = vadd.xlane.f32.xlu1 %v562_v27  ;;  %521 = vmatpush.bf16.msrb.mxu2 %v512_v28 }
 0x404   : > { %v569_v29 = vpop.permute.xlu0 %568 }
 0x405   : > { %v574_v30 = vsel %vm453_vm6, %v569_v29, 0 }
 0x406   : > { %583 = vmatpush.bf16.msrb.mxu1 %v574_v30 }
 0x40a   : > { %782 = vmatpush.bf16.msra.mxu1 %v1046_v24 }
 0x44b   : > { %v444_v31 = vpop.xlane.xlu1 %443 }
 0x44c   : > { %1147 = vrcp.f32 %v444_v31 }
 0x452   : > { %v1148_v32 = vpop.eup %1147 }
 0x453   : > { %v446_v33 = vmul.f32 %v1148_v32, %v1140_v8 }
 0x455   : > { %v447_v35 = vpack.c.bf16 %v446_v33, %v446_v33 }
 0x457   : > { %994 = vmatmul.msk.bf16.vlgmr.msra.gmra.mxu2 %vm416_vm5, %v447_v35 }
 0x458   : > { %645 = vmatpush.bf16.msra.mxu2 %v636_v36 }
 0x459   : > { %v502_v37 = vpop.xlane.xlu1 %501 }
 0x45a   : > { %1149 = vrcp.f32 %v502_v37  ;;  %v1133_v37 = vld [vmem:[%s1502_s5] ss:$0 sm:$0xff] }
 0x460   : > { %v1150_v38 = vpop.eup %1149 }
 0x461   : > { %v504_v39 = vmul.f32 %v1150_v38, %v1142_v14 }
 0x463   : > { %v505_v40 = vpack.c.bf16 %v504_v39, %v504_v39 }
 0x467   : > { %996 = vmatmul.msk.bf16.vlgmr.msrb.gmra.mxu2 %vm416_vm5, %v505_v40 }
 0x469   : > { %v626_v41 = vpop.xlane.xlu1 %625 }
 0x46a   : > { %1151 = vrcp.f32 %v626_v41 }
 0x470   : > { %v1152_v42 = vpop.eup %1151 }
 0x471   : > { %v628_v43 = vmul.f32 %v1152_v42, %v1144_v23  ;;  %v564_v44 = vpop.xlane.xlu1 %563 }
 0x472   : > { %1153 = vrcp.f32 %v564_v44  ;;  %v1050_v44 = vld [vmem:[%s1503_s6 + $0x18] sm:$0xff] }
 0x473   : > { %v629_v45 = vpack.c.bf16 %v628_v43, %v628_v43  ;;  %878 = vmatpush.bf16.msra.mxu3 %v1050_v44 }
 0x477   : > { %1000 = vmatmul.msk.bf16.vlgmr.msra.gmra.mxu2 %vm416_vm5, %v629_v45 }
 0x478   : > { %v1154_v46 = vpop.eup %1153 }
 0x479   : > { %v566_v47 = vmul.f32 %v1154_v46, %v1146_v25  ;;  %v1045_v25 = vld [vmem:[#allocation3] sm:$0xff] }
 0x47a   : > { %783 = vmatpush.bf16.msra.mxu1 %v1045_v25 }
 0x47b   : > { %v567_v48 = vpack.c.bf16 %v566_v47, %v566_v47 }
 0x47d   : > { %998 = vmatmul.msk.bf16.vlgmr.msrb.gmra.mxu1 %vm416_vm5, %v567_v48 }
 0x4da   : > { %v466_v49 = vpop.f32.mrf.mxu2 }
 0x4db   : > { %470 = vst.msk [vmem:[#allocation2] sm:$0xff] %vm416_vm5, %v466_v49  ;;  %v1049_v49 = vld [vmem:[%s1503_s6 + $0x10] sm:$0xff] }
 0x4dc   : > { %879 = vmatpush.bf16.msra.mxu3 %v1049_v49 }
 0x4e2   : > { %v468_v50 = vpop.f32.mrf.mxu2 }
 0x4ea   : > { %v523_v51 = vpop.f32.mrf.mxu2 }
 0x4eb   : > { %528 = vrot.lane.b32.xlu1 %v523_v51, %s1272_s26 }
 0x4f2   : > { %v525_v52 = vpop.f32.mrf.mxu2 }
 0x4fa   : > { %v585_v53 = vpop.f32.mrf.mxu1  ;;  %v647_v54 = vpop.f32.mrf.mxu2 }
 0x4fb   : > { %590 = vrot.lane.b32.xlu2 %v585_v53, %s1273_s10  ;;  %652 = vrot.lane.b32.xlu0 %v647_v54, %s1274_s12  ;;  %v1048_v54 = vld [vmem:[%s1503_s6 + $0x8] sm:$0xff] }
 0x4fc   : > { %880 = vmatpush.bf16.msra.mxu3 %v1048_v54 }
 0x500   : > { %881 = vmatpush.bf16.msra.mxu3 %v1047_v58 }
 0x502   : > { %v587_v55 = vpop.f32.mrf.mxu1  ;;  %v649_v56 = vpop.f32.mrf.mxu2 }
 0x555   : > { %v591_v60 = vpop.permute.xlu2 %590 }
 0x55d   : > { %v529_v59 = vpop.permute.xlu1 %528 }
 0x55e   : > { %532 = vst.msk [vmem:[#allocation2] sm:$0xff] %vm531_vm7, %v529_v59 }
 0x55f   : > { %594 = vst.msk [vmem:[#allocation2] sm:$0xff] %vm593_vm8, %v591_v60 }
 0x56d   : > { %v653_v61 = vpop.permute.xlu0 %652 }
 0x56e   : > { %656 = vst.msk [vmem:[#allocation2] sm:$0xff] %vm655_vm9, %v653_v61 }
 0x575   : > { %v657_v62 = vld [vmem:[#allocation2] sm:$0xff] }
 0x576   : > { %v658_v63 = vpack.c.bf16 %v657_v62, %v657_v62 }
 0x578   : > { %1009 = vmatmul.msk.bf16.vlgmr.msra.gmra.mxu0 %vm320_vm0, %v658_v63 }
 0x5f5   : > { %v691_v2 = vpop.f32.mrf.mxu0 }
 0x5f6   : > { %v692_v3 = vadd.f32 %v1132_v1, %v691_v2 }
 0x5f8   : > { %v1436_v4 = vadd.f32 %v692_v3, %v1383_v0 }
 0x5fa   : > { %v696_v5 = vsel %vm320_vm0, %v1436_v4, 0.0 }
 0x5fb   : > { %697 = vadd.xlane.f32.xlu2 %v696_v5 }
 0x5fd   : > { %v693_v6 = vpop.f32.mrf.mxu0 }
 0x66e   : > { %v698_v7 = vpop.xlane.xlu2 %697 }
 0x66f   : > { %v699_v8 = vrot.slane %v698_v7, 4 }
 0x671   : > { %v700_v9 = vadd.f32 %v699_v8, %v698_v7 }
 0x673   : > { %v701_v10 = vrot.slane %v700_v9, 2 }
 0x675   : > { %v702_v11 = vadd.f32 %v701_v10, %v700_v9 }
 0x677   : > { %v703_v12 = vrot.slane %v702_v11, 1 }
 0x679   : > { %v704_v13 = vadd.f32 %v703_v12, %v702_v11 }
 0x67b   : > { %1059 = vpush %v704_v13 }
 0x6ac   : > { %s1060_s23 = spop %1059 }
 0x6ad   : > { %s714_s24 = smul.f32 %s1060_s23, %s1387_s17 }
 0x6af   : > { %v715_v14 = vstv %s714_s24 }
 0x6b0   : > { %v716_v15 = vsub.f32 %v1436_v4, %v715_v14 }
 0x6b2   : > { %v717_v0 = vmul.f32 %v716_v15, %v716_v15 }
 0x6b4   : > { %v718_v16 = vsel %vm320_vm0, %v717_v0, 0.0 }
 0x6b5   : > { %719 = vadd.xlane.f32.xlu0 %v718_v16 }
 0x728   : > { %v720_v17 = vpop.xlane.xlu0 %719 }
 0x729   : > { %v721_v18 = vrot.slane %v720_v17, 4 }
 0x72b   : > { %v722_v19 = vadd.f32 %v721_v18, %v720_v17 }
 0x72d   : > { %v723_v20 = vrot.slane %v722_v19, 2 }
 0x72f   : > { %v724_v21 = vadd.f32 %v723_v20, %v722_v19 }
 0x731   : > { %v725_v22 = vrot.slane %v724_v21, 1 }
 0x733   : > { %v726_v23 = vadd.f32 %v725_v22, %v724_v21  ;;  %v1134_v22 = vld [vmem:[%s1504_s7] ss:$0 sm:$0xff] }
 0x735   : > { %1061 = vpush %v726_v23 }
 0x766   : > { %s1062_s25 = spop %1061 }
 0x767   : > { %s736_s26 = smul.f32 %s1062_s25, %s1387_s17 }
 0x769   : > { %s737_s10 = sadd.f32 1e-05, %s736_s26  ;;  %s311_s26 = sand.u32 1, %s1247_s28  }
 0x76b   : > { %v738_v26 = vstv %s737_s10  ;;  %s982_s10 = sshll.u32 %s311_s26, 3 }
 0x76c   : > { %1155 = vrsqrt.f32 %v738_v26  ;;  %vm745_vm11 = vweird.f32 %v738_v26  ;;  %s313_s21 = scalar_lea.vmem [#allocation6], %s982_s10  ;;  %s1209_s10 = scalar_lea.hbm %s1505_s8, 16 }
 0x76d   : > { %s902_s22 = sshll.u32 %s313_s21, 4  ;;  %s903_s22 = int_to_ptr.vmem [resolvable:$true] %s902_s22 }
 0x772   : > { %v1156_v27 = vpop.eup %1155 }
 0x773   : > { %v740_v28 = vmul.f32 %v1156_v27, %v738_v26  ;;  %vm746_vm10 = vweird.f32 %v1156_v27 }
 0x774   : > { %vm747_vm12 = vmor %vm745_vm11, %vm746_vm10 }
 0x775   : > { %v741_v29 = vmul.f32 %v1156_v27, %v740_v28 }
 0x777   : > { %v742_v30 = vmul.f32 0.5, %v741_v29 }
 0x779   : > { %v743_v31 = vsub.f32 1.5, %v742_v30 }
 0x77b   : > { %v744_v32 = vmul.f32 %v1156_v27, %v743_v31 }
 0x77d   : > { %v748_v33 = vsel %vm747_vm12, %v1156_v27, %v744_v32 }
 0x77e   : > { %1063 = vpush %v748_v33 }
 0x7af   : > { %s1064_s12 = spop %1063 }
 0x7b0   : > { %v750_v34 = vstv %s1064_s12  ;;  %s1038_s12 = sshll.u32 %s1341_s9, 3  ;;  %s890_s9 = scalar_lea.sflag [#allocation5], %s311_s26 }
 0x7b1   : > { %v751_v35 = vmul.f32 %v750_v34, %v716_v15  ;;  %s900_s20 = scalar_lea.hbm %s1505_s8, %s1038_s12 }
 0x7b2   : > { %s904_s23 = sshll.u32 %s900_s20, 4  ;;  %s905_s23 = int_to_ptr.hbm [resolvable:$true] %s904_s23 }
 0x7b3   : > { %v752_v36 = vpack.c.bf16 %v751_v35, %v751_v35  ;;  %s1203_s24 = sshra.s32 %s905_s23, 4  ;;  %s1204_s24 = int_to_ptr.hbm [resolvable:$true] %s1203_s24 }
 0x7b4   : > { %s1205_s25 = scalar_lea.hbm %s1204_s24, 8  ;;  %p1210_p3 = scmp.lt.s32.totalorder %s1204_s24, %s1505_s8 }
 0x7b5   : > { %1018 = vmatmul.msk.bf16.vlgmr.msra.gmra.mxu1 %vm320_vm0, %v752_v36  ;;  %p1206_p0 = scmp.ne.s32.totalorder %s1204_s24, %s1205_s25  ;;  %p1211_p4 = scmp.lt.s32.totalorder %s1209_s10, %s1205_s25 }
 0x7b7   : > { %p1207_p1 = pnand %p1206_p0, %p1358_p5  ;;  %p1212_p7 = por %p1211_p4, %p1210_p3 }
 0x7b9   : > { %p1208_p2 = pneg %p1207_p1 }
 0x7bb   : > { %p1213_p8 = pnand %p1212_p7, %p1208_p2 }
 0x832   : > { %v785_v38 = vpop.f32.mrf.mxu1 }
 0x833   : > { %v786_v39 = vadd.f32 %v1133_v37, %v785_v38 }
 0x835   : > { %v790_v40 = vmul.f32 0.70710677, %v786_v39  ;;  %v789_v18 = vmul.f32 0.5, %v786_v39 }
 0x837   : > { %v791_v41 = vmul.f32 %v790_v40, %v790_v40 }
 0x839   : > { %v792_v42 = vmin.f32 %v791_v41, 16.0 }
 0x83a   : > { %v787_v43 = vpop.f32.mrf.mxu1 }
 0x83b   : > { %v793_v45 = vmul.f32 2.1237322e-06, %v792_v42  ;;  %v804_v46 = vmul.f32 3.8918573e-05, %v792_v42 }
 0x83d   : > { %v794_v47 = vadd.f32 0.00028619796, %v793_v45  ;;  %v805_v48 = vadd.f32 0.001143296, %v804_v46 }
 0x83f   : > { %v795_v50 = vmul.f32 %v794_v47, %v792_v42  ;;  %v806_v51 = vmul.f32 %v805_v48, %v792_v42 }
 0x841   : > { %v807_v52 = vadd.f32 0.014752088, %v806_v51  ;;  %v796_v53 = vadd.f32 0.0036580483, %v795_v50 }
 0x843   : > { %v808_v55 = vmul.f32 %v807_v52, %v792_v42  ;;  %v797_v57 = vmul.f32 %v796_v53, %v792_v42 }
 0x845   : > { %v809_v56 = vadd.f32 0.112945676, %v808_v55  ;;  %v798_v61 = vadd.f32 0.05243302, %v797_v57 }
 0x847   : > { %v810_v59 = vmul.f32 %v809_v56, %v792_v42  ;;  %v799_v1 = vmul.f32 %v798_v61, %v792_v42 }
 0x849   : > { %v811_v60 = vadd.f32 0.4994258, %v810_v59  ;;  %v800_v2 = vadd.f32 0.18741608, %v799_v1 }
 0x84b   : > { %v812_v62 = vmul.f32 %v811_v60, %v792_v42  ;;  %v801_v5 = vmul.f32 %v800_v2, %v792_v42 }
 0x84d   : > { %v813_v63 = vadd.f32 1.0, %v812_v62  ;;  %v802_v9 = vadd.f32 1.1283791, %v801_v5 }
 0x84f   : > { %1157 = vrcp.f32 %v813_v63  ;;  %v825_v8 = vand.u32 2147483648, %v813_v63  ;;  %v823_v11 = vand.u32 2147483647, %v813_v63  ;;  %vm819_vm14 = vweird.f32 %v813_v63 }
 0x850   : > { %v803_v14 = vmul.f32 %v802_v9, %v790_v40 }
 0x851   : > { %v826_v13 = vor.u32 1.1754944e-38, %v825_v8  ;;  %vm824_vm1 = vcmp.eq.f32.partialorder %v823_v11, 8.507059e+37 }
 0x855   : > { %v1158_v3 = vpop.eup %1157 }
 0x856   : > { %v815_v6 = vmul.f32 %v1158_v3, %v813_v63  ;;  %vm820_vm13 = vweird.f32 %v1158_v3 }
 0x857   : > { %vm821_vm15 = vmor %vm819_vm14, %vm820_vm13 }
 0x858   : > { %v816_v7 = vsub.f32 1.0, %v815_v6 }
 0x85a   : > { %v817_v10 = vmul.f32 %v1158_v3, %v816_v7 }
 0x85c   : > { %v818_v12 = vadd.f32 %v1158_v3, %v817_v10 }
 0x85e   : > { %v822_v15 = vsel %vm821_vm15, %v1158_v3, %v818_v12 }
 0x85f   : > { %v827_v0 = vsel %vm824_vm1, %v826_v13, %v822_v15 }
 0x860   : > { %v828_v16 = vmul.f32 %v827_v0, %v803_v14 }
 0x862   : > { %v1019_v17 = vclamps-f32 %v828_v16, 1.0 }
 0x864   : > { %v831_v19 = vadd.f32 1.0, %v1019_v17 }
 0x866   : > { %v832_v20 = vmul.f32 %v831_v19, %v789_v18 }
 0x868   : > { %v833_v21 = vpack.c.bf16 %v832_v20, %v832_v20 }
 0x86a   : > { %1036 = vmatmul.msk.bf16.vlgmr.msra.gmra.mxu3 %vm870_vm2, %v833_v21 }
 0x8ed   : > { %v883_v23 = vpop.f32.mrf.mxu3 }
 0x8ee   : > { %v884_v24 = vadd.f32 %v1134_v22, %v883_v23 }
 0x8f0   : > { %v887_v25 = vadd.f32 %v884_v24, %v1436_v4 }
 0x8f2   : > { %888 = vst.msk [vmem:[%s313_s21] sm:$0xff] %vm320_vm0, %v887_v25 }
 0x8f3   : > { %1216 = shalt.err (!%p1213_p8)
}
 0x8f4   : > { %1069 = dma.vmem_to_hbm [thread:$0]  (%p1358_p5), %s903_s22, 128, %s905_s23, %s890_s9  }
 0x8f5   : > { %v885_v4 = vpop.f32.mrf.mxu3 }
 0x8f6 PF: > { %p1081_p9 = scmp.ge.s32.totalorder %s1255_s30, 2  ;;  %s916_s26 = sand.u32 1, %s1243_s27  }
 0x8f7   : > { %s917_s19 = scalar_lea.sflag [#allocation5], %s916_s26 }
 0x8f8   : > { %p1076_p10 = pnand %p1081_p9, %p1362_p6 }
 0x8fa   : > { %p1077_p11 = pneg %p1076_p10 }
 0x8fc   : > { %1238 = dma.done.wait (%p1077_p11), %s917_s19, 128  }
 0x8fd   : > { %1240 = vsyncadd (%p1077_p11), %s917_s19, 4294967168  ;;  %p19_p12 = scmp.ge.s32.totalorder %s1345_s11, 4   ;;  %s1508_s27 = smov %s1247_s28 }
 0x8fe   : > { %s1509_s28 = smov %s1251_s29  ;;  %s1510_s29 = smov %s1356_s14 }
 0x8ff   : > { %s1511_s30 = smov %s1345_s11  ;;  %21 = sbr.rel (!%p19_p12) target bundleno = 4 (0x4), region = 92 }
 0x904   :  { %923 = vsyncpa [#allocation4], 1 }
 0x905   :  { %925 = vsyncpa [#allocation4 + $0x1], 1 }
 0x906   :  { %926 = vsyncpa [#allocation5], 1 }
 0x907   :  { %928 = vsyncpa [#allocation5 + $0x1], 1 }

</bundles_post_ra>
